<compile_context>
chip_gen: v7x
topology: tpu7x:2x2x1
jax: 0.10.0
libtpu: 0.0.40
codegen_flags: <defaults>
</compile_context>

<pallas_src>
import functools

import jax
import jax.numpy as jnp
from jax.experimental import pallas as pl
from jax.experimental.pallas import tpu as pltpu


def _han_kernel(bias_ref,                      # SMEM (2L,): [2l]=bnode+wnb.b1, [2l+1]=bedge
                x_ref,                         # VMEM (Np, Cp) f32 (read at l == 0 only)
                maskA_hbm, H_hbm,              # HBM (pl.ANY); DMA'd once into VMEM scratch
                W1_ref,                        # VMEM (Cp, Cp) bf16 per layer (wna/wea folded in)
                rows_ref,                      # VMEM (8, Cp) f32 per layer:
                                               #   0=b1_aug 1=wnb@W1 2=web 3=gamma_f 4=beta_f
                out_ref,                       # VMEM (Np, Cp) f32, resident carry across layers
                maskA_vmem, H_vmem, sem,       # scratch
                *, Nr, sa_col, ta_col):
    f32, bf16 = jnp.float32, jnp.bfloat16
    l = pl.program_id(0)

    @pl.when(l == 0)
    def _():
        # Seed the residual carry and pull the layer-invariant 0/1 matrices
        # into VMEM exactly once (single-buffered, no per-layer DMA).
        out_ref[...] = x_ref[...]
        cA = pltpu.make_async_copy(maskA_hbm, maskA_vmem, sem.at[0])
        cH = pltpu.make_async_copy(H_hbm, H_vmem, sem.at[1])
        cA.start()
        cH.start()
        cA.wait()
        cH.wait()

    rows = rows_ref[...]
    b1 = rows[0:1, :]
    wnbW1 = rows[1:2, :]
    web = rows[2:3, :]
    gamma = rows[3:4, :]
    beta = rows[4:5, :]
    bnode = bias_ref[2 * l]
    bedge = bias_ref[2 * l + 1]

    x_full = out_ref[...]                      # (Np, Cp) f32, padded rows/cols inert
    x = x_full[:Nr, :]                         # real node rows only
    Hs = H_vmem[:Nr, :]                        # (Nr, Ep) bf16 incidence
    maskA = maskA_vmem[:Nr, :]                 # (Nr, Np) bf16 adjacency

    # x_n = W1(x); spare padded columns sa_col/ta_col of W1/b1 hold the folded
    # wna/wea projections, so s_a / t_a come out of the same matmul.
    x_n = jnp.dot(x.astype(bf16), W1_ref[...], preferred_element_type=f32) + b1
    s_a = x_n[:, sa_col:sa_col + 1]            # (Nr, 1) = wna . x_n[i]
    t_a = x_n[:, ta_col:ta_col + 1]            # (Nr, 1) = wea . x_n[i]

    # s_b[j] = wnb . x_n[j] over ALL node columns, computed straight from x
    # (wnb folded through W1; wnb.b1 folded into bnode on the host).
    s_b = jax.lax.dot_general(wnbW1, x_full, (((1,), (1,)), ((), ())),
                              preferred_element_type=f32)            # (1, Np)

    # Node-pair attention on A's edges, masked by the adjacency.
    A = jax.nn.sigmoid(s_a + s_b + bnode).astype(bf16) * maskA       # (Nr, Np) bf16

    # v2e: weights = (A @ H) at incidences; weighted mean onto hyperedges
    # (divide by per-hyperedge weight sum, inf-free).
    Q = jnp.dot(A, H_vmem[...], preferred_element_type=f32) * Hs.astype(f32)  # (Nr, Ep)
    de = jnp.sum(Q, axis=0, keepdims=True)                            # (1, Ep)
    de_nz = (de != 0.0).astype(f32)
    Qn = (Q * (de_nz * pl.reciprocal(de + (1.0 - de_nz), approx=True))).astype(bf16)
    X_L = jax.lax.dot_general(Qn, x_n.astype(bf16), (((0,), (0,)), ((), ())),
                              preferred_element_type=f32)             # (Ep, Cp)

    # e2v: edge attention per incidence; weighted mean back to nodes + residual.
    t_b = jax.lax.dot_general(web, X_L, (((1,), (1,)), ((), ())),
                              preferred_element_type=f32)             # (1, Ep)
    P = jax.nn.sigmoid(t_a + t_b + bedge).astype(bf16) * Hs           # (Nr, Ep) bf16
    dv = jnp.sum(P.astype(f32), axis=1, keepdims=True)                # (Nr, 1)
    dv_nz = (dv != 0.0).astype(f32)
    Sv = jnp.dot(P, X_L.astype(bf16), preferred_element_type=f32)     # (Nr, Cp)
    x_out = Sv * (dv_nz * pl.reciprocal(dv + (1.0 - dv_nz), approx=True)) + x

    # HANConv tail (is_last=False): ReLU -> BatchNorm1d(eval; 1/sqrt(var+eps)
    # pre-folded into gamma/beta) -> Dropout(eval = id), then the HAN loop ReLU.
    x_out = jnp.maximum(x_out, 0.0)
    x_out = x_out * gamma + beta
    out_ref[:Nr, :] = jnp.maximum(x_out, 0.0)


def _round_up(v, m):
    return (v + m - 1) // m * m


def _pad2(a, rows, cols):
    return jnp.pad(a, ((0, rows - a.shape[0]), (0, cols - a.shape[1])))


def han_forward(x, X_L, maskA, H, layer_params):
    """HAN.forward (eval mode), dense-masked equivalent of the aggr='mean' path."""
    del X_L  # W2(X_L) in the reference is dead code (immediately overwritten).
    N, C = x.shape
    E = H.shape[1]
    L = len(layer_params)

    Np, Ep, Cp = _round_up(N, 128), _round_up(E, 128), _round_up(C, 128)
    if Cp - C < 2:                # need two spare lanes for the folded wna/wea columns
        Cp += 128
    Nr = _round_up(N, 16)         # real node rows (bf16 sublane granularity)
    sa_col, ta_col = Cp - 2, Cp - 1

    # Lane-dense zero padding; padded rows/cols of maskA / H are zero => inert.
    xp = _pad2(x, Np, Cp).astype(jnp.float32)
    maskAp = _pad2(maskA, Np, Np).astype(jnp.bfloat16)   # 0/1 exact in bf16
    Hp = _pad2(H, Np, Ep).astype(jnp.bfloat16)

    eps = 1e-5
    W1_l, rows_l, bias_l = [], [], []
    for p in layer_params:
        W1, b1 = p["W1"], p["b1"]
        wna, wnb, bnode = p["wna"], p["wnb"], p["bnode"]
        wea, web, bedge = p["wea"], p["web"], p["bedge"]

        # W1 / b1 augmented with the wna / wea column projections in spare lanes.
        W1a = jnp.zeros((Cp, Cp), jnp.float32)
        W1a = W1a.at[:C, :C].set(W1)
        W1a = W1a.at[:C, sa_col].set((W1 @ wna.T)[:, 0])
        W1a = W1a.at[:C, ta_col].set((W1 @ wea.T)[:, 0])
        b1a = jnp.zeros((1, Cp), jnp.float32)
        b1a = b1a.at[0, :C].set(b1[0])
        b1a = b1a.at[0, sa_col].set((b1 @ wna.T)[0, 0])
        b1a = b1a.at[0, ta_col].set((b1 @ wea.T)[0, 0])

        wnbW1 = jnp.zeros((1, Cp), jnp.float32).at[0, :C].set((wnb @ W1.T)[0])
        webp = jnp.zeros((1, Cp), jnp.float32).at[0, :C].set(web[0])

        inv_std = 1.0 / jnp.sqrt(p["var"] + eps)          # BN scale folded on host
        gamma_f = jnp.zeros((1, Cp), jnp.float32).at[0, :C].set((p["gamma"] * inv_std)[0])
        beta_f = jnp.zeros((1, Cp), jnp.float32).at[0, :C].set(
            (p["beta"] - p["mean"] * p["gamma"] * inv_std)[0])

        rows_l.append(jnp.concatenate(
            [b1a, wnbW1, webp, gamma_f, beta_f, jnp.zeros((3, Cp), jnp.float32)], axis=0))
        W1_l.append(W1a.astype(jnp.bfloat16))
        bias_l.append(jnp.array([bnode[0, 0] + (wnb @ b1.T)[0, 0], bedge[0, 0]],
                                jnp.float32))

    W1s = jnp.stack(W1_l)                     # (L, Cp, Cp) bf16
    rows = jnp.stack(rows_l)                  # (L, 8, Cp)  f32
    bias = jnp.stack(bias_l).reshape(-1)      # (2L,)       f32 -> SMEM

    kernel = functools.partial(_han_kernel, Nr=Nr, sa_col=sa_col, ta_col=ta_col)

    out_padded = pl.pallas_call(
        kernel,
        out_shape=jax.ShapeDtypeStruct((Np, Cp), jnp.float32),
        grid=(L,),
        in_specs=[
            pl.BlockSpec(memory_space=pltpu.MemorySpace.SMEM),    # bias (2L,)
            pl.BlockSpec((Np, Cp), lambda l: (0, 0)),             # x (fetched once)
            pl.BlockSpec(memory_space=pl.ANY),                    # maskA (HBM, one-time DMA)
            pl.BlockSpec(memory_space=pl.ANY),                    # H     (HBM, one-time DMA)
            pl.BlockSpec((None, Cp, Cp), lambda l: (l, 0, 0)),    # W1_aug (bf16)
            pl.BlockSpec((None, 8, Cp), lambda l: (l, 0, 0)),     # coalesced row params
        ],
        out_specs=pl.BlockSpec((Np, Cp), lambda l: (0, 0)),       # resident carry
        scratch_shapes=[
            pltpu.VMEM((Np, Np), jnp.bfloat16),                   # maskA, single-buffered
            pltpu.VMEM((Np, Ep), jnp.bfloat16),                   # H, single-buffered
            pltpu.SemaphoreType.DMA((2,)),
        ],
        compiler_params=pltpu.CompilerParams(
            dimension_semantics=("arbitrary",)),
    )(bias, xp, maskAp, Hp, W1s, rows)

    # Final F.dropout(x, p, training=False) -> identity (eval mode).
    # TODO(synk): training-mode dropout / BatchNorm batch statistics not modeled.
    return out_padded[:N, :C]


def init_layer_params(key, C):
    ks = jax.random.split(key, 6)
    s1 = 1.0 / jnp.sqrt(float(C))
    s2 = 1.0 / jnp.sqrt(float(2 * C))
    W1 = jax.random.uniform(ks[0], (C, C), jnp.float32, -s1, s1)
    b1 = jax.random.uniform(ks[1], (1, C), jnp.float32, -s1, s1)
    wn = jax.random.uniform(ks[2], (1, 2 * C), jnp.float32, -s2, s2)
    bnode = jax.random.uniform(ks[3], (1, 1), jnp.float32, -s2, s2)
    we = jax.random.uniform(ks[4], (1, 2 * C), jnp.float32, -s2, s2)
    bedge = jax.random.uniform(ks[5], (1, 1), jnp.float32, -s2, s2)
    return dict(
        W1=W1, b1=b1,
        wna=wn[:, :C], wnb=wn[:, C:], bnode=bnode,
        wea=we[:, :C], web=we[:, C:], bedge=bedge,
        gamma=jnp.ones((1, C), jnp.float32), beta=jnp.zeros((1, C), jnp.float32),
        mean=jnp.zeros((1, C), jnp.float32), var=jnp.ones((1, C), jnp.float32),
    )


if __name__ == "__main__":
    N, E, C = 64, 32, 32          # nodes, hyperedges, channels (input == hidden)
    num_layers = 2

    key = jax.random.PRNGKey(0)
    k_x, k_xl, k_h, k_a, k_p = jax.random.split(key, 5)

    x = jax.random.normal(k_x, (N, C), jnp.float32)
    X_L = jax.random.normal(k_xl, (E, C), jnp.float32)                   # signature parity
    H = (jax.random.uniform(k_h, (N, E)) < 0.2).astype(jnp.float32)      # 0/1 incidence
    maskA = (jax.random.uniform(k_a, (N, N)) < 0.2).astype(jnp.float32)  # 0/1 adjacency

    layer_params = [init_layer_params(k, C) for k in jax.random.split(k_p, num_layers)]

    out = han_forward(x, X_L, maskA, H, layer_params)
    jax.block_until_ready(out)
    assert out.shape == (N, C) and jnp.isfinite(out).all()
    print("KERNEL_OK")
</pallas_src>

<mosaic_0001>
module attributes {stable_mosaic.version = 11 : i64} {
  func.func @_han_kernel(%arg0: i32, %arg1: memref<4xf32, #tpu.memory_space<smem>>, %arg2: memref<128x128xf32, #tpu.memory_space<vmem>>, %arg3: memref<128x128xbf16, #tpu.memory_space<any>>, %arg4: memref<128x128xbf16, #tpu.memory_space<any>>, %arg5: memref<1x128x128xbf16, #tpu.memory_space<vmem>>, %arg6: memref<1x8x128xf32, #tpu.memory_space<vmem>>, %arg7: memref<128x128xf32, #tpu.memory_space<vmem>>, %arg8: memref<128x128xbf16, #tpu.memory_space<vmem>>, %arg9: memref<128x128xbf16, #tpu.memory_space<vmem>>, %arg10: memref<2x!tpu.dma_semaphore, #tpu.memory_space<semaphore_mem>>) attributes {dimension_semantics = [#tpu.dimension_semantics<arbitrary>], iteration_bounds = array<i64: 2>, scalar_prefetch = 0 : i64, scratch_operands = 3 : i64, tpu.core_type = #tpu.core_type<tc>, window_params = [{transform_indices = @transform_0, window_bounds = array<i64: 4>}, {pipeline_mode = #tpu.pipeline_mode<synchronous>, transform_indices = @transform_1, window_bounds = array<i64: 128, 128>}, {}, {}, {transform_indices = @transform_4, window_bounds = array<i64: 1, 128, 128>}, {transform_indices = @transform_5, window_bounds = array<i64: 1, 8, 128>}, {pipeline_mode = #tpu.pipeline_mode<synchronous>, transform_indices = @transform_6, window_bounds = array<i64: 128, 128>}]} {
    %c0_i32 = arith.constant 0 : i32
    %0 = arith.cmpi eq, %arg0, %c0_i32 : i32
    %1 = arith.extui %0 : i1 to i32
    %c0_i32_0 = arith.constant 0 : i32
    %2 = arith.cmpi ne, %1, %c0_i32_0 : i32
    scf.if %2 {
      %c0_32 = arith.constant 0 : index
      %c0_33 = arith.constant 0 : index
      %101 = vector.load %arg2[%c0_32, %c0_33] : memref<128x128xf32, #tpu.memory_space<vmem>>, vector<128x128xf32>
      %c0_34 = arith.constant 0 : index
      %c0_35 = arith.constant 0 : index
      %102 = vector.load %arg7[%c0_34, %c0_35] : memref<128x128xf32, #tpu.memory_space<vmem>>, vector<128x128xf32>
      tpu.vector_store %arg7[%c0_34, %c0_35], %101 {strides = array<i32>} : memref<128x128xf32, #tpu.memory_space<vmem>>, vector<128x128xf32>,
      %c0_i32_36 = arith.constant 0 : i32
      %103 = tpu.memref_slice %arg10[%c0_i32_36] : memref<2x!tpu.dma_semaphore, #tpu.memory_space<semaphore_mem>> -> memref<1x!tpu.dma_semaphore, #tpu.memory_space<semaphore_mem>>
      %104 = tpu.memref_squeeze %103 : memref<1x!tpu.dma_semaphore, #tpu.memory_space<semaphore_mem>> -> memref<!tpu.dma_semaphore, #tpu.memory_space<semaphore_mem>>
      tpu.enqueue_dma source(%arg3 : memref<128x128xbf16, #tpu.memory_space<any>>) target(%arg8 : memref<128x128xbf16, #tpu.memory_space<vmem>>) target_semaphore(%104 : memref<!tpu.dma_semaphore, #tpu.memory_space<semaphore_mem>>)
      %c1_i32_37 = arith.constant 1 : i32
      %105 = tpu.memref_slice %arg10[%c1_i32_37] : memref<2x!tpu.dma_semaphore, #tpu.memory_space<semaphore_mem>> -> memref<1x!tpu.dma_semaphore, #tpu.memory_space<semaphore_mem>>
      %106 = tpu.memref_squeeze %105 : memref<1x!tpu.dma_semaphore, #tpu.memory_space<semaphore_mem>> -> memref<!tpu.dma_semaphore, #tpu.memory_space<semaphore_mem>>
      tpu.enqueue_dma source(%arg4 : memref<128x128xbf16, #tpu.memory_space<any>>) target(%arg9 : memref<128x128xbf16, #tpu.memory_space<vmem>>) target_semaphore(%106 : memref<!tpu.dma_semaphore, #tpu.memory_space<semaphore_mem>>)
      %c0_i32_38 = arith.constant 0 : i32
      %107 = tpu.memref_slice %arg10[%c0_i32_38] : memref<2x!tpu.dma_semaphore, #tpu.memory_space<semaphore_mem>> -> memref<1x!tpu.dma_semaphore, #tpu.memory_space<semaphore_mem>>
      %108 = tpu.memref_squeeze %107 : memref<1x!tpu.dma_semaphore, #tpu.memory_space<semaphore_mem>> -> memref<!tpu.dma_semaphore, #tpu.memory_space<semaphore_mem>>
      tpu.wait_dma2 semaphore(%108 : memref<!tpu.dma_semaphore, #tpu.memory_space<semaphore_mem>>) src(%arg3 : memref<128x128xbf16, #tpu.memory_space<any>>) dst(%arg8 : memref<128x128xbf16, #tpu.memory_space<vmem>>)
      %c1_i32_39 = arith.constant 1 : i32
      %109 = tpu.memref_slice %arg10[%c1_i32_39] : memref<2x!tpu.dma_semaphore, #tpu.memory_space<semaphore_mem>> -> memref<1x!tpu.dma_semaphore, #tpu.memory_space<semaphore_mem>>
      %110 = tpu.memref_squeeze %109 : memref<1x!tpu.dma_semaphore, #tpu.memory_space<semaphore_mem>> -> memref<!tpu.dma_semaphore, #tpu.memory_space<semaphore_mem>>
      tpu.wait_dma2 semaphore(%110 : memref<!tpu.dma_semaphore, #tpu.memory_space<semaphore_mem>>) src(%arg4 : memref<128x128xbf16, #tpu.memory_space<any>>) dst(%arg9 : memref<128x128xbf16, #tpu.memory_space<vmem>>)
    } else {
    }
    %c0 = arith.constant 0 : index
    %c0_1 = arith.constant 0 : index
    %c0_2 = arith.constant 0 : index
    %3 = vector.load %arg6[%c0, %c0_1, %c0_2] : memref<1x8x128xf32, #tpu.memory_space<vmem>>, vector<1x8x128xf32>
    %4 = vector.shape_cast %3 : vector<1x8x128xf32> to vector<8x128xf32>
    %5 = vector.extract_strided_slice %4 {offsets = [0, 0], sizes = [1, 128], strides = [1, 1]} : vector<8x128xf32> to vector<1x128xf32>
    %6 = vector.extract_strided_slice %4 {offsets = [1, 0], sizes = [1, 128], strides = [1, 1]} : vector<8x128xf32> to vector<1x128xf32>
    %7 = vector.extract_strided_slice %4 {offsets = [2, 0], sizes = [1, 128], strides = [1, 1]} : vector<8x128xf32> to vector<1x128xf32>
    %8 = vector.extract_strided_slice %4 {offsets = [3, 0], sizes = [1, 128], strides = [1, 1]} : vector<8x128xf32> to vector<1x128xf32>
    %9 = vector.extract_strided_slice %4 {offsets = [4, 0], sizes = [1, 128], strides = [1, 1]} : vector<8x128xf32> to vector<1x128xf32>
    %c2_i32 = arith.constant 2 : i32
    %10 = arith.muli %c2_i32, %arg0 : i32
    %11 = arith.index_cast %10 : i32 to index
    %12 = memref.load %arg1[%11] : memref<4xf32, #tpu.memory_space<smem>>
    %c2_i32_3 = arith.constant 2 : i32
    %13 = arith.muli %c2_i32_3, %arg0 : i32
    %c1_i32 = arith.constant 1 : i32
    %14 = arith.addi %13, %c1_i32 : i32
    %15 = arith.index_cast %14 : i32 to index
    %16 = memref.load %arg1[%15] : memref<4xf32, #tpu.memory_space<smem>>
    %c0_4 = arith.constant 0 : index
    %c0_5 = arith.constant 0 : index
    %17 = vector.load %arg7[%c0_4, %c0_5] : memref<128x128xf32, #tpu.memory_space<vmem>>, vector<128x128xf32>
    %18 = vector.extract_strided_slice %17 {offsets = [0, 0], sizes = [64, 128], strides = [1, 1]} : vector<128x128xf32> to vector<64x128xf32>
    %c0_6 = arith.constant 0 : index
    %c0_7 = arith.constant 0 : index
    %19 = vector.load %arg9[%c0_6, %c0_7] : memref<128x128xbf16, #tpu.memory_space<vmem>>, vector<64x128xbf16>
    %c0_8 = arith.constant 0 : index
    %c0_9 = arith.constant 0 : index
    %20 = vector.load %arg8[%c0_8, %c0_9] : memref<128x128xbf16, #tpu.memory_space<vmem>>, vector<64x128xbf16>
    %21 = arith.truncf %18 : vector<64x128xf32> to vector<64x128xbf16>
    %c0_10 = arith.constant 0 : index
    %c0_11 = arith.constant 0 : index
    %c0_12 = arith.constant 0 : index
    %22 = vector.load %arg5[%c0_10, %c0_11, %c0_12] : memref<1x128x128xbf16, #tpu.memory_space<vmem>>, vector<1x128x128xbf16>
    %23 = vector.shape_cast %22 : vector<1x128x128xbf16> to vector<128x128xbf16>
    %cst = arith.constant dense<0.000000e+00> : vector<64x128xf32>
    %24 = tpu.matmul %21, %23, %cst {dimension_numbers = #tpu.dot_dimension_numbers<[1], [0], [0], [1], [0, 0, 1, 1], [], []>} : vector<64x128xbf16>, vector<128x128xbf16>, vector<64x128xf32> -> vector<64x128xf32>
    %25 = vector.broadcast %5 : vector<1x128xf32> to vector<64x128xf32>
    %26 = arith.addf %24, %25 : vector<64x128xf32>
    %27 = vector.extract_strided_slice %26 {offsets = [0, 126], sizes = [64, 1], strides = [1, 1]} : vector<64x128xf32> to vector<64x1xf32>
    %28 = vector.extract_strided_slice %26 {offsets = [0, 127], sizes = [64, 1], strides = [1, 1]} : vector<64x128xf32> to vector<64x1xf32>
    %cst_13 = arith.constant dense<0.000000e+00> : vector<1x128xf32>
    %29 = tpu.matmul %6, %17, %cst_13 {dimension_numbers = #tpu.dot_dimension_numbers<[1], [1], [0], [0], [0, 0, 1, 0], [], []>} : vector<1x128xf32>, vector<128x128xf32>, vector<1x128xf32> -> vector<1x128xf32>
    %30 = vector.broadcast %27 : vector<64x1xf32> to vector<64x128xf32>
    %31 = vector.broadcast %29 : vector<1x128xf32> to vector<64x128xf32>
    %32 = arith.addf %30, %31 : vector<64x128xf32>
    %33 = vector.broadcast %12 : f32 to vector<64x128xf32>
    %34 = arith.addf %32, %33 : vector<64x128xf32>
    %35 = arith.negf %34 : vector<64x128xf32>
    %36 = math.exp %35 : vector<64x128xf32>
    %cst_14 = arith.constant 1.000000e+00 : f32
    %37 = vector.broadcast %cst_14 : f32 to vector<64x128xf32>
    %38 = arith.addf %37, %36 : vector<64x128xf32>
    %39 = arith.divf %37, %38 : vector<64x128xf32>
    %40 = arith.truncf %39 : vector<64x128xf32> to vector<64x128xbf16>
    %41 = arith.mulf %40, %20 : vector<64x128xbf16>
    %c0_15 = arith.constant 0 : index
    %c0_16 = arith.constant 0 : index
    %42 = vector.load %arg9[%c0_15, %c0_16] : memref<128x128xbf16, #tpu.memory_space<vmem>>, vector<128x128xbf16>
    %cst_17 = arith.constant dense<0.000000e+00> : vector<64x128xf32>
    %43 = tpu.matmul %41, %42, %cst_17 {dimension_numbers = #tpu.dot_dimension_numbers<[1], [0], [0], [1], [0, 0, 1, 1], [], []>} : vector<64x128xbf16>, vector<128x128xbf16>, vector<64x128xf32> -> vector<64x128xf32>
    %44 = arith.extf %19 : vector<64x128xbf16> to vector<64x128xf32>
    %45 = arith.mulf %43, %44 : vector<64x128xf32>
    %cst_18 = arith.constant dense<0.000000e+00> : vector<128xf32>
    %46 = vector.multi_reduction <add>, %45, %cst_18 [0] : vector<64x128xf32> to vector<128xf32>
    %47 = vector.shape_cast %46 : vector<128xf32> to vector<1x128xf32>
    %cst_19 = arith.constant 0.000000e+00 : f32
    %48 = vector.broadcast %cst_19 : f32 to vector<1x128xf32>
    %49 = arith.cmpf one, %47, %48 : vector<1x128xf32>
    %50 = arith.extui %49 : vector<1x128xi1> to vector<1x128xi32>
    %51 = arith.sitofp %50 : vector<1x128xi32> to vector<1x128xf32>
    %cst_20 = arith.constant 1.000000e+00 : f32
    %52 = vector.broadcast %cst_20 : f32 to vector<1x128xf32>
    %53 = arith.subf %52, %51 : vector<1x128xf32>
    %54 = arith.addf %47, %53 : vector<1x128xf32>
    %55 = tpu.reciprocal %54 {approx = true} : vector<1x128xf32> -> vector<1x128xf32>
    %56 = arith.mulf %51, %55 : vector<1x128xf32>
    %57 = vector.broadcast %56 : vector<1x128xf32> to vector<64x128xf32>
    %58 = arith.mulf %45, %57 : vector<64x128xf32>
    %59 = arith.truncf %58 : vector<64x128xf32> to vector<64x128xbf16>
    %60 = arith.truncf %26 : vector<64x128xf32> to vector<64x128xbf16>
    %cst_21 = arith.constant dense<0.000000e+00> : vector<128x128xf32>
    %61 = tpu.matmul %59, %60, %cst_21 {dimension_numbers = #tpu.dot_dimension_numbers<[0], [0], [1], [1], [0, 1, 1, 1], [], []>} : vector<64x128xbf16>, vector<64x128xbf16>, vector<128x128xf32> -> vector<128x128xf32>
    %cst_22 = arith.constant dense<0.000000e+00> : vector<1x128xf32>
    %62 = tpu.matmul %7, %61, %cst_22 {dimension_numbers = #tpu.dot_dimension_numbers<[1], [1], [0], [0], [0, 0, 1, 0], [], []>} : vector<1x128xf32>, vector<128x128xf32>, vector<1x128xf32> -> vector<1x128xf32>
    %63 = vector.broadcast %28 : vector<64x1xf32> to vector<64x128xf32>
    %64 = vector.broadcast %62 : vector<1x128xf32> to vector<64x128xf32>
    %65 = arith.addf %63, %64 : vector<64x128xf32>
    %66 = vector.broadcast %16 : f32 to vector<64x128xf32>
    %67 = arith.addf %65, %66 : vector<64x128xf32>
    %68 = arith.negf %67 : vector<64x128xf32>
    %69 = math.exp %68 : vector<64x128xf32>
    %cst_23 = arith.constant 1.000000e+00 : f32
    %70 = vector.broadcast %cst_23 : f32 to vector<64x128xf32>
    %71 = arith.addf %70, %69 : vector<64x128xf32>
    %72 = arith.divf %70, %71 : vector<64x128xf32>
    %73 = arith.truncf %72 : vector<64x128xf32> to vector<64x128xbf16>
    %74 = arith.mulf %73, %19 : vector<64x128xbf16>
    %75 = arith.extf %74 : vector<64x128xbf16> to vector<64x128xf32>
    %cst_24 = arith.constant dense<0.000000e+00> : vector<64xf32>
    %76 = vector.multi_reduction <add>, %75, %cst_24 [1] : vector<64x128xf32> to vector<64xf32>
    %77 = vector.shape_cast %76 : vector<64xf32> to vector<64x1xf32>
    %cst_25 = arith.constant 0.000000e+00 : f32
    %78 = vector.broadcast %cst_25 : f32 to vector<64x1xf32>
    %79 = arith.cmpf one, %77, %78 : vector<64x1xf32>
    %80 = arith.extui %79 : vector<64x1xi1> to vector<64x1xi32>
    %81 = arith.sitofp %80 : vector<64x1xi32> to vector<64x1xf32>
    %82 = arith.truncf %61 : vector<128x128xf32> to vector<128x128xbf16>
    %cst_26 = arith.constant dense<0.000000e+00> : vector<64x128xf32>
    %83 = tpu.matmul %74, %82, %cst_26 {dimension_numbers = #tpu.dot_dimension_numbers<[1], [0], [0], [1], [0, 0, 1, 1], [], []>} : vector<64x128xbf16>, vector<128x128xbf16>, vector<64x128xf32> -> vector<64x128xf32>
    %cst_27 = arith.constant 1.000000e+00 : f32
    %84 = vector.broadcast %cst_27 : f32 to vector<64x1xf32>
    %85 = arith.subf %84, %81 : vector<64x1xf32>
    %86 = arith.addf %77, %85 : vector<64x1xf32>
    %87 = tpu.reciprocal %86 {approx = true} : vector<64x1xf32> -> vector<64x1xf32>
    %88 = arith.mulf %81, %87 : vector<64x1xf32>
    %89 = vector.broadcast %88 : vector<64x1xf32> to vector<64x128xf32>
    %90 = arith.mulf %83, %89 : vector<64x128xf32>
    %91 = arith.addf %90, %18 : vector<64x128xf32>
    %cst_28 = arith.constant 0.000000e+00 : f32
    %92 = vector.broadcast %cst_28 : f32 to vector<64x128xf32>
    %93 = arith.maximumf %91, %92 : vector<64x128xf32>
    %94 = vector.broadcast %8 : vector<1x128xf32> to vector<64x128xf32>
    %95 = arith.mulf %93, %94 : vector<64x128xf32>
    %96 = vector.broadcast %9 : vector<1x128xf32> to vector<64x128xf32>
    %97 = arith.addf %95, %96 : vector<64x128xf32>
    %cst_29 = arith.constant 0.000000e+00 : f32
    %98 = vector.broadcast %cst_29 : f32 to vector<64x128xf32>
    %99 = arith.maximumf %97, %98 : vector<64x128xf32>
    %c0_30 = arith.constant 0 : index
    %c0_31 = arith.constant 0 : index
    %100 = vector.load %arg7[%c0_30, %c0_31] : memref<128x128xf32, #tpu.memory_space<vmem>>, vector<64x128xf32>
    tpu.vector_store %arg7[%c0_30, %c0_31], %99 {strides = array<i32>} : memref<128x128xf32, #tpu.memory_space<vmem>>, vector<64x128xf32>,
    return
  }
  func.func @transform_0(%arg0: i32) -> i32 {
    %c0_i32 = arith.constant 0 : i32
    %c0_i32_0 = arith.constant 0 : i32
    return %c0_i32 : i32
  }
  func.func @transform_1(%arg0: i32) -> (i32, i32) {
    %c0_i32 = arith.constant 0 : i32
    %c0_i32_0 = arith.constant 0 : i32
    %c0_i32_1 = arith.constant 0 : i32
    return %c0_i32, %c0_i32_0 : i32, i32
  }
  func.func @transform_4(%arg0: i32) -> (i32, i32, i32) {
    %c0_i32 = arith.constant 0 : i32
    %c0_i32_0 = arith.constant 0 : i32
    %c0_i32_1 = arith.constant 0 : i32
    return %arg0, %c0_i32, %c0_i32_0 : i32, i32, i32
  }
  func.func @transform_5(%arg0: i32) -> (i32, i32, i32) {
    %c0_i32 = arith.constant 0 : i32
    %c0_i32_0 = arith.constant 0 : i32
    %c0_i32_1 = arith.constant 0 : i32
    return %arg0, %c0_i32, %c0_i32_0 : i32, i32, i32
  }
  func.func @transform_6(%arg0: i32) -> (i32, i32) {
    %c0_i32 = arith.constant 0 : i32
    %c0_i32_0 = arith.constant 0 : i32
    %c0_i32_1 = arith.constant 0 : i32
    return %c0_i32, %c0_i32_0 : i32, i32
  }
}

</mosaic_0001>

<bundles_post_ra>
// kernel: tpu_custom_call.1
= control target key start
LH: loop header
LB: loop body
LE: loop exit
PB: predicated region body
PF: predicated region fallthrough
CT: control target
= control target key end

     0   :  { %11 = vsyncpa [#allocation8], 0  ;;  %s2597_s0 = inlined_call_operand.hbm [shape: f32[4], index: 0, kind: input, shape index: {}]   ;;  %s2598_s1 = inlined_call_operand.hbm [shape: f32[128,128], index: 1, kind: input, shape index: {}]   ;;  %s2599_s2 = inlined_call_operand.hbm [shape: bf16[128,128], index: 2, kind: input, shape index: {}]   ;;  %s2600_s3 = inlined_call_operand.hbm [shape: bf16[128,128], index: 3, kind: input, shape index: {}]   ;;  %s2601_s4 = inlined_call_operand.hbm [shape: bf16[2,128,128], index: 4, kind: input, shape index: {}]   ;;  %s2602_s5 = inlined_call_operand.vmem [shape: f32[2,8,128], index: 5, kind: input, shape index: {}]   ;;  %s2603_s6 = inlined_call_operand.hbm [shape: f32[128,128], index: 6, kind: output, shape index: {}]  }
   0x1   :  { %12 = vsyncpa [#allocation6], 0 }
   0x2   :  { %13 = vsyncpa [#allocation11], 0 }
   0x3   :  { %15 = vsyncpa [#allocation11 + $0x1], 0 }
   0x4   :  { %16 = vsyncpa [#allocation7], 0  ;;  %s2228_s21 = smov 0   ;;  %s2230_s22 = smov 0  }
   0x5   :  { %s2232_s23 = smov 0   ;;  %s2234_s24 = smov 0  }
   0x6 LB: > { %s2247_s25 = sadd.s32 4294967295, %s2174_s24   ;;  %s2250_s26 = sadd.s32 1, %s2174_s24   ;;  %s2174_s24 = sphi %s2234_s24, %s2619_s24   ;;  %s2170_s23 = sphi %s2232_s23, %s2618_s23   ;;  %s2166_s22 = sphi %s2230_s22, %s2617_s22   ;;  %s2162_s21 = sphi %s2228_s21, %s2616_s21  }
   0x7   : > { %s68_s27 = ssub.s32 %s2174_s24, %s2250_s26  ;;  %s71_s28 = sadd.s32 1, %s2170_s23 }
   0x8   : > { %p69_p0 = scmp.eq.s32.totalorder %s68_s27, 0  ;;  %p78_p1 = scmp.ne.s32.totalorder %s2170_s23, %s2166_s22 }
   0x9   : > { %p79_p2 = scmp.eq.s32.totalorder %s2174_s24, 0  ;;  %p84_p3 = scmp.ne.s32.totalorder %s2166_s22, %s2162_s21 }
   0xa   : > { %s2260_s29 = scalar_select %p69_p0, %s2170_s23, %s71_s28  }
   0xb   : > { %p80_p4 = por %p79_p2, %p78_p1  ;;  %p2604_p5 = scmp.eq.s32.totalorder %s2247_s25, 0 }
   0xc   : > { %p1442_p6 = scmp.ge.s32.totalorder %s2174_s24, 1  ;;  %p142_p7 = scmp.lt.s32.totalorder %s2174_s24, 3 }
   0xd   : > { %p2267_p8 = por %p2604_p5, %p84_p3  ;;  %p1827_p11 = scmp.lt.s32.totalorder %s2174_s24, 2 }
   0xe   : > { %p2272_p10 = pnand %p1442_p6, %p142_p7  ;;  %s2176_s9 = smov [#allocation9]  }
   0xf   : > { %s2606_s30 = scalar_select %p2267_p8, 1, 0 }
  0x10   : > { %p1814_p12 = pneg %p2272_p10  ;;  %p2279_p13 = pnand %p1827_p11, %p80_p4 }
  0x11   : > { %s163_s10 = sshll.u32 %s2176_s9, 4  ;;  %s1983_s14 = scalar_lea.hbm %s2597_s0, 16  ;;  %s2289_s10 = int_to_ptr.vmem [resolvable:$true] %s163_s10 }
  0x12   : > { %p2285_p0 = pnand %p1814_p12, %p2604_p5  ;;  %p1984_p1 = scmp.ne.s32.totalorder %s2597_s0, %s1983_s14 }
  0x13   : > { %p1990_p6 = scmp.lt.u32.totalorder %s1983_s14, %s2597_s0 }
  0x14   : > { %p1985_p2 = pneg %p2285_p0 }
  0x16   : > { %p1986_p3 = pnand %p1985_p2, %p1984_p1 }
  0x18   : > { %p1987_p4 = pneg %p1986_p3 }
  0x1a   : > { %p1992_p7 = pnand %p1990_p6, %p1987_p4 }
  0x1c   : > { %1995 = shalt.err (!%p1992_p7)
}
  0x1d   : > { %s2177_s19 = smov [#allocation5]   ;;  %s1996_s9 = scalar_lea.hbm %s2598_s1, 2048 }
  0x1e   : > { %1817 = dma.hbm_to_smem (!%p2285_p0), %s2597_s0, 16, %s2177_s19, [#allocation8]  }
  0x1f   : > { %p1997_p11 = scmp.ne.s32.totalorder %s2598_s1, %s1996_s9  ;;  %p2003_p3 = scmp.lt.u32.totalorder %s1996_s9, %s2598_s1 }
  0x21   : > { %p1999_p12 = pnand %p1997_p11, %p1985_p2 }
  0x23   : > { %p2000_p1 = pneg %p1999_p12 }
  0x25   : > { %p2005_p4 = pnand %p2003_p3, %p2000_p1 }
  0x27   : > { %2008 = shalt.err (!%p2005_p4)
}
  0x28   : > { %s2009_s16 = scalar_lea.vmem %s2289_s10, 2048  ;;  %p2017_p5 = scmp.lt.s32.totalorder %s2289_s10, %s2289_s10 }
  0x29   : > { %p2010_p6 = scmp.ne.s32.totalorder %s2289_s10, %s2009_s16  ;;  %p2018_p11 = scmp.lt.s32.totalorder %s2009_s16, %s2009_s16 }
  0x2b   : > { %p2012_p7 = pnand %p2010_p6, %p1985_p2  ;;  %p2019_p12 = por %p2018_p11, %p2017_p5 }
  0x2d   : > { %p2013_p9 = pneg %p2012_p7 }
  0x2f   : > { %p2020_p8 = pnand %p2019_p12, %p2013_p9 }
  0x31   : > { %2023 = shalt.err (!%p2020_p8)
}
  0x32   : > { %s2178_s17 = smov 128   ;;  %s2179_s18 = smov 8  }
  0x33   : > { %1820 = dma.hbm_to_vmem [thread:$0]  (!%p2285_p0), %s2598_s1, 2048, %s2289_s10, [#allocation6], %s2178_s17, %s2178_s17, %s2179_s18  }
  0x34   : > { %s177_s21 = sand.u32 1, %s2170_s23   ;;  %s1503_s27 = sshll.u32 %s2174_s24, 10 }
  0x35   : > { %s1446_s28 = sshll.u32 %s177_s21, 6  ;;  %s2340_s13 = scalar_lea.hbm %s2601_s4, %s1503_s27 }
  0x36   : > { %s181_s14 = scalar_lea.vmem [#allocation10], %s1446_s28  ;;  %s2344_s11 = scalar_lea.sflag [#allocation11], %s177_s21 }
  0x37   : > { %s188_s15 = sshll.u32 %s181_s14, 4  ;;  %s2024_s16 = scalar_lea.hbm %s2340_s13, 1024  ;;  %s2342_s15 = int_to_ptr.vmem [resolvable:$true] %s188_s15 }
  0x38   : > { %p2025_p5 = scmp.ne.s32.totalorder %s2340_s13, %s2024_s16  ;;  %p2026_p8 = pneg %p2279_p13 }
  0x39   : > { %s2029_s17 = scalar_lea.hbm %s2601_s4, 2048  ;;  %p2030_p2 = scmp.lt.u32.totalorder %s2340_s13, %s2601_s4 }
  0x3a   : > { %p2027_p9 = pnand %p2026_p8, %p2025_p5  ;;  %p2031_p1 = scmp.lt.u32.totalorder %s2029_s17, %s2024_s16 }
  0x3b   : > { %p2033_p4 = scmp.lt.u32.totalorder %s2024_s16, %s2340_s13 }
  0x3c   : > { %p2028_p0 = pneg %p2027_p9  ;;  %p2032_p3 = por %p2031_p1, %p2030_p2 }
  0x3e   : > { %p2034_p6 = por %p2033_p4, %p2032_p3 }
  0x40   : > { %p2035_p7 = pnand %p2034_p6, %p2028_p0 }
  0x42   : > { %2038 = shalt.err (!%p2035_p7)
}
  0x43   : > { %s2039_s20 = scalar_lea.vmem %s2342_s15, 1024  ;;  %s2180_s21 = smov [#allocation10]  }
  0x44   : > { %p2040_p11 = scmp.ne.s32.totalorder %s2342_s15, %s2039_s20  ;;  %s2044_s27 = sshll.u32 %s2180_s21, 4  ;;  %s2045_s27 = int_to_ptr.vmem [resolvable:$false] %s2044_s27 }
  0x45   : > { %s2046_s28 = scalar_lea.vmem %s2045_s27, 2048  ;;  %p2047_p9 = scmp.lt.s32.totalorder %s2342_s15, %s2045_s27 }
  0x46   : > { %p2042_p12 = pnand %p2040_p11, %p2026_p8  ;;  %p2048_p2 = scmp.lt.s32.totalorder %s2046_s28, %s2039_s20 }
  0x48   : > { %p2043_p5 = pneg %p2042_p12  ;;  %p2049_p1 = por %p2048_p2, %p2047_p9 }
  0x4a   : > { %p2050_p3 = pnand %p2049_p1, %p2043_p5 }
  0x4c   : > { %2053 = shalt.err (!%p2050_p3)
}
  0x4d   : > { %s2181_s9 = smov 64   ;;  %s2182_s12 = smov 4  }
  0x4e   : > { %1824 = dma.hbm_to_vmem [thread:$0]  (!%p2279_p13), %s2340_s13, 1024, %s2342_s15, %s2344_s11, %s2181_s9, %s2181_s9, %s2182_s12  }
  0x4f   : > { %207 = sbr.rel (%p2272_p10) target bundleno = 1709 (0x6ad), region = 36  ;;  %p2610_p8 = scmp.eq.s32.totalorder (!%p2272_p10), %s2247_s25, 0 }
  0x56   : > { %2141 = dma.done.wait (%p2610_p8), [#allocation8], 16   ;;  %p2611_p0 = pmov %p2610_p8 }
  0x58   : > { %2143 = vsyncadd (%p2611_p0), [#allocation8], 4294967280  ;;  %p2612_p4 = pmov %p2611_p0 }
  0x59   : > { %p2613_p6 = pmov %p2611_p0 }
  0x5a   : > { %2145 = dma.done.wait (%p2612_p4), [#allocation6], 2048  }
  0x5b   : > { %2147 = vsyncadd (%p2613_p6), [#allocation6], 4294965248  ;;  %s217_s14 = sand.u32 1, %s2166_s22   ;;  %p2614_p10 = scmp.ne.s32.totalorder %s2606_s30, 0 }
  0x5c   : > { %s1452_s8 = sshll.u32 %s217_s14, 6  ;;  %s218_s13 = scalar_lea.sflag [#allocation11], %s217_s14 }
  0x5d   : > { %s2383_s15 = scalar_lea.vmem [#allocation10], %s1452_s8 }
  0x5e   : > { %2149 = dma.done.wait (%p2614_p10), %s218_s13, 1024  }
  0x5f   : > { %2151 = vsyncadd (%p2614_p10), %s218_s13, 4294966272 }
  0x60   : > { %226 = sfence }
  0x61   : > { %p246_p13 = scmp.lt.s32.totalorder %s2247_s25, 1  ;;  %p2615_p7 = scmp.ne.s32.totalorder %s2247_s25, 0 }
  0x62   : > { %v255_v0 = vld [vmem:[#allocation9] sm:$0xff] (!%p2615_p7)  ;;  %v256_v1 = vld [vmem:[#allocation9 + $0x8] sm:$0xff] (!%p2615_p7)  ;;  %v257_v2 = vld [vmem:[#allocation9 + $0x10] sm:$0xff] (!%p2615_p7)  ;;  %s2183_s17 = smov (!%p2615_p7), [#allocation2]   ;;  %s2184_s18 = smov (!%p2615_p7), [#allocation3]  }
  0x63   : > { %s247_s7 = scalar_select %p246_p13, %s2247_s25, 1 }
  0x64   : > { %254 = sbr.rel (%p2615_p7) target bundleno = 137 (0x89), region = 52  ;;  %s294_s30 = sshll.u32 (!%p2615_p7), %s2183_s17, 4  ;;  %271 = vst [vmem:[#allocation12] sm:$0xff] (!%p2615_p7), %v255_v0  ;;  %272 = vst [vmem:[#allocation12 + $0x8] sm:$0xff] (!%p2615_p7), %v256_v1  ;;  %v258_v3 = vld [vmem:[#allocation9 + $0x18] sm:$0xff] (!%p2615_p7)  ;;  %v259_v4 = vld [vmem:[#allocation9 + $0x20] sm:$0xff] (!%p2615_p7)  ;;  %s295_s30 = int_to_ptr.vmem [resolvable:$true] %s294_s30 }
  0x65   : > { %s1453_s11 = sshll.u32 %s247_s7, 3  ;;  %273 = vst [vmem:[#allocation12 + $0x10] sm:$0xff] (!%p2615_p7), %v257_v2  ;;  %v260_v5 = vld [vmem:[#allocation9 + $0x28] sm:$0xff] (!%p2615_p7)  ;;  %s306_s19 = sshll.u32 (!%p2615_p7), %s2184_s18, 4  ;;  %274 = vst [vmem:[#allocation12 + $0x18] sm:$0xff] (!%p2615_p7), %v258_v3  ;;  %v261_v6 = vld [vmem:[#allocation9 + $0x30] sm:$0xff] (!%p2615_p7)  ;;  %s2398_s19 = int_to_ptr.vmem [resolvable:$true] %s306_s19 }
  0x66   : > { %s2394_s10 = scalar_lea.vmem %s2602_s5, %s1453_s11  ;;  %275 = vst [vmem:[#allocation12 + $0x20] sm:$0xff] (!%p2615_p7), %v259_v4  ;;  %276 = vst [vmem:[#allocation12 + $0x28] sm:$0xff] (!%p2615_p7), %v260_v5  ;;  %v262_v7 = vld [vmem:[#allocation9 + $0x38] sm:$0xff] (!%p2615_p7)  ;;  %v263_v8 = vld [vmem:[#allocation9 + $0x40] sm:$0xff] (!%p2615_p7)  ;;  %s2054_s27 = scalar_lea.hbm (!%p2615_p7), %s2599_s2, 1024 }
  0x67   : > { %p2055_p11 = scmp.ne.s32.totalorder (!%p2615_p7), %s2599_s2, %s2054_s27  ;;  %p2058_p12 = scmp.lt.u32.totalorder (!%p2615_p7), %s2054_s27, %s2599_s2 }
  0x69   : > { %p2060_p5 = pnand (!%p2615_p7), %p2058_p12, %p2055_p11 }
  0x6b   : > { %2063 = shalt.err (!%p2060_p5)  }
  0x6c   : > { %s2064_s8 = scalar_lea.vmem %s295_s30, 1024  ;;  %p2069_p2 = scmp.lt.s32.totalorder %s295_s30, %s295_s30 }
  0x6d   : > { %p2065_p9 = scmp.ne.s32.totalorder %s295_s30, %s2064_s8  ;;  %p2070_p1 = scmp.lt.s32.totalorder %s2064_s8, %s2064_s8 }
  0x6f   : > { %p2071_p3 = por %p2070_p1, %p2069_p2 }
  0x71   : > { %p2072_p8 = pnand %p2071_p3, %p2065_p9 }
  0x73   : > { %2075 = shalt.err (!%p2072_p8)  }
  0x74   : > { %297 = dma.hbm_to_vmem [thread:$0]  %s2599_s2, 1024, %s295_s30, [#allocation4]  ;;  %277 = vst [vmem:[#allocation12 + $0x30] sm:$0xff] %v261_v6  ;;  %278 = vst [vmem:[#allocation12 + $0x38] sm:$0xff] %v262_v7  ;;  %v264_v9 = vld [vmem:[#allocation9 + $0x48] sm:$0xff]  ;;  %v265_v10 = vld [vmem:[#allocation9 + $0x50] sm:$0xff] }
  0x75   : > { %279 = vst [vmem:[#allocation12 + $0x40] sm:$0xff] %v263_v8  ;;  %v266_v11 = vld [vmem:[#allocation9 + $0x58] sm:$0xff]  ;;  %280 = vst [vmem:[#allocation12 + $0x48] sm:$0xff] %v264_v9  ;;  %v267_v12 = vld [vmem:[#allocation9 + $0x60] sm:$0xff]  ;;  %s2076_s24 = scalar_lea.hbm %s2600_s3, 1024 }
  0x76   : > { %281 = vst [vmem:[#allocation12 + $0x50] sm:$0xff] %v265_v10  ;;  %282 = vst [vmem:[#allocation12 + $0x58] sm:$0xff] %v266_v11  ;;  %v268_v13 = vld [vmem:[#allocation9 + $0x68] sm:$0xff]  ;;  %v269_v14 = vld [vmem:[#allocation9 + $0x70] sm:$0xff]  ;;  %p2077_p0 = scmp.ne.s32.totalorder %s2600_s3, %s2076_s24  ;;  %p2080_p4 = scmp.lt.u32.totalorder %s2076_s24, %s2600_s3 }
  0x78   : > { %p2082_p6 = pnand %p2080_p4, %p2077_p0 }
  0x7a   : > { %2085 = shalt.err (!%p2082_p6)  }
  0x7b   : > { %s2086_s21 = scalar_lea.vmem %s2398_s19, 1024  ;;  %p2091_p13 = scmp.lt.s32.totalorder %s2398_s19, %s2398_s19 }
  0x7c   : > { %p2087_p10 = scmp.ne.s32.totalorder %s2398_s19, %s2086_s21  ;;  %p2092_p7 = scmp.lt.s32.totalorder %s2086_s21, %s2086_s21 }
  0x7e   : > { %p2093_p11 = por %p2092_p7, %p2091_p13 }
  0x80   : > { %p2094_p12 = pnand %p2093_p11, %p2087_p10 }
  0x82   : > { %2097 = shalt.err (!%p2094_p12)  }
  0x83   : > { %309 = dma.hbm_to_vmem [thread:$0]  %s2600_s3, 1024, %s2398_s19, [#allocation4 + $0x1]  ;;  %283 = vst [vmem:[#allocation12 + $0x60] sm:$0xff] %v267_v12  ;;  %284 = vst [vmem:[#allocation12 + $0x68] sm:$0xff] %v268_v13  ;;  %v270_v15 = vld [vmem:[#allocation9 + $0x78] sm:$0xff] }
  0x84   : > { %285 = vst [vmem:[#allocation12 + $0x70] sm:$0xff] %v269_v14  ;;  %286 = vst [vmem:[#allocation12 + $0x78] sm:$0xff] %v270_v15 }
  0x85   : > { %2152 = dma.done.wait [#allocation4], 1024 }
  0x86   : > { %2153 = vsyncadd [#allocation4], 4294966272 }
  0x87   : > { %2154 = dma.done.wait [#allocation4 + $0x1], 1024 }
  0x88   : > { %2155 = vsyncadd [#allocation4 + $0x1], 4294966272 }
  0x89 PF: > { %v1885_v16 = vld [vmem:[%s2383_s15] sm:$0xff]   ;;  %v1886_v17 = vld [vmem:[%s2383_s15 + $0x8] sm:$0xff]   ;;  %v2185_v18 = vmov 0.0|0.0   ;;  %vm2186_vm0 = vmmov 0   ;;  %v2187_v19 = vmov 0.0   ;;  %v1887_v20 = vld [vmem:[%s2383_s15 + $0x10] sm:$0xff]   ;;  %v365_v61 = vlaneseq }
  0x8a   : > { %1752 = vmatprep.subr.bf16.mxu1 %v2185_v18  ;;  %1586 = vmatprep.subr.bf16.mxu0 %v1885_v16  ;;  %v1888_v21 = vld [vmem:[%s2383_s15 + $0x18] sm:$0xff]   ;;  %v321_v22 = vld [vmem:[#allocation12] sm:$0xff]  ;;  %v322_v23 = vld [vmem:[#allocation12 + $0x8] sm:$0xff]  ;;  %v2188_v59 = vmov 126   ;;  %vm813_vm2 = vcmask 523264   ;;  %s2190_s12 = smov [#allocation12]  }
  0x8b   : > { %1587 = vmatpush3.bf16.msra.mxu0 %v1885_v16  ;;  %1642 = vmatprep.mubr.msk.f32.mxu1 %vm2186_vm0, %v2187_v19  ;;  %v345_v24 = vpack.c.bf16 %v322_v23, %v321_v22  ;;  %v1889_v25 = vld [vmem:[%s2383_s15 + $0x20] sm:$0xff]   ;;  %v323_v26 = vld [vmem:[#allocation12 + $0x10] sm:$0xff]  ;;  %v324_v27 = vld [vmem:[#allocation12 + $0x18] sm:$0xff]  ;;  %v2470_v62 = vshrl.u32 %v365_v61, 7  ;;  %v2189_v23 = vmov 127   ;;  %s1339_s14 = sshll.u32 %s2190_s12, 4  ;;  %s1340_s14 = int_to_ptr.vmem [resolvable:$true] %s1339_s14 }
  0x8c   : > { %1588 = vmatprep.subr.bf16.mxu0 %v1886_v17  ;;  %v1890_v28 = vld [vmem:[%s2383_s15 + $0x28] sm:$0xff]   ;;  %v346_v29 = vpack.c.bf16 %v324_v27, %v323_v26  ;;  %v1891_v30 = vld [vmem:[%s2383_s15 + $0x30] sm:$0xff]   ;;  %v325_v31 = vld [vmem:[#allocation12 + $0x20] sm:$0xff]  ;;  %1882 = vset.pattern.permute.xlu1 %v2188_v59  ;;  %p1830_p5 = scmp.eq.s32.totalorder %s2247_s25, 1  ;;  %s2098_s8 = scalar_lea.vmem %s1340_s14, 2048 }
  0x8d   : > { %1602 = vmatprep.mubr.bf16.mxu0 %v345_v24  ;;  %1754 = vmatpush3.bf16.xpose.msra.mxu1 %v345_v24  ;;  %v326_v32 = vld [vmem:[#allocation12 + $0x28] sm:$0xff]  ;;  %v1892_v33 = vld [vmem:[%s2383_s15 + $0x38] sm:$0xff]   ;;  %v2443_v35 = vld [vmem:[#allocation3] sm:$0xff]  ;;  %v2473_v63 = vsub.s32 0, %v2470_v62  ;;  %s1455_s15 = sshll.u32 %s2247_s25, 1  ;;  %p2099_p9 = scmp.ne.s32.totalorder %s1340_s14, %s2098_s8 }
  0x8e   : > { %1755 = vmatprep.subr.bf16.mxu1 %v2185_v18  ;;  %v347_v34 = vpack.c.bf16 %v326_v32, %v325_v31  ;;  %v327_v36 = vld [vmem:[#allocation12 + $0x30] sm:$0xff]  ;;  %v328_v37 = vld [vmem:[#allocation12 + $0x38] sm:$0xff]  ;;  %v2446_v38 = vld [vmem:[#allocation3 + $0x8] sm:$0xff]  ;;  %1881 = vset.pattern.permute.xlu0 %v2188_v59  ;;  %s319_s19 = sadd.s32 1, %s1455_s15  ;;  %p2105_p3 = scmp.lt.s32.totalorder %s1340_s14, %s1340_s14 }
  0x8f   : > { %1589 = vmatpush3.bf16.msra.mxu0 %v1886_v17  ;;  %v348_v39 = vpack.c.bf16 %v328_v37, %v327_v36  ;;  %v329_v40 = vld [vmem:[#allocation12 + $0x40] sm:$0xff]  ;;  %v330_v41 = vld [vmem:[#allocation12 + $0x48] sm:$0xff]  ;;  %v2451_v42 = vld [vmem:[#allocation3 + $0x10] sm:$0xff]  ;;  %s320_s9 = sld [smem:[#allocation5 + %s319_s19]]  ;;  %p2100_p2 = pnand %p2099_p9, %p1830_p5 }
  0x90   : > { %1590 = vmatprep.subr.bf16.mxu0 %v1887_v20  ;;  %v1765_v43 = vpack.c.bf16 %v330_v41, %v329_v40  ;;  %v2455_v44 = vld [vmem:[#allocation3 + $0x18] sm:$0xff]  ;;  %v331_v45 = vld [vmem:[#allocation12 + $0x50] sm:$0xff]  ;;  %v676_v47 = vld [vmem:[#allocation3 + $0x20] sm:$0xff]  ;;  %p2106_p8 = scmp.lt.s32.totalorder %s2098_s8, %s2098_s8 }
  0x91   : > { %v332_v46 = vld [vmem:[#allocation12 + $0x58] sm:$0xff]  ;;  %v677_v49 = vld [vmem:[#allocation3 + $0x28] sm:$0xff]  ;;  %v333_v50 = vld [vmem:[#allocation12 + $0x60] sm:$0xff]  ;;  %p2101_p1 = pneg %p2100_p2 }
  0x92   : > { %v1768_v48 = vpack.c.bf16 %v332_v46, %v331_v45  ;;  %v334_v51 = vld [vmem:[#allocation12 + $0x68] sm:$0xff]  ;;  %v335_v53 = vld [vmem:[#allocation12 + $0x70] sm:$0xff]  ;;  %v336_v54 = vld [vmem:[#allocation12 + $0x78] sm:$0xff]  ;;  %p2107_p0 = por %p2106_p8, %p2105_p3 }
  0x93   : > { %1591 = vmatpush3.bf16.msra.mxu0 %v1887_v20  ;;  %v1771_v52 = vpack.c.bf16 %v334_v51, %v333_v50  ;;  %v1774_v55 = vpack.c.bf16 %v336_v54, %v335_v53  ;;  %v2464_v56 = vld [vmem:[%s2394_s10] sm:$0xff]  ;;  %v679_v60 = vld [vmem:[#allocation3 + $0x38] sm:$0xff]  ;;  %s318_s10 = sld [smem:[#allocation5 + %s1455_s15]] }
  0x94   : > { %1592 = vmatprep.subr.bf16.mxu0 %v1888_v21  ;;  %v483_v57 = vrot.slane %v2464_v56, 1  ;;  %v678_v58 = vld [vmem:[#allocation3 + $0x30] sm:$0xff]  ;;  %v368_v0 = vrot.slane %v2464_v56, %v2473_v63  ;;  %p2108_p4 = pnand %p2107_p0, %p2101_p1 }
  0x95   : > { %1757 = vmatpush3.bf16.xpose.msra.mxu1 %v346_v29 }
  0x96   : > { %1758 = vmatprep.subr.bf16.mxu1 %v2185_v18 }
  0x97   : > { %1593 = vmatpush3.bf16.msra.mxu0 %v1888_v21 }
  0x98   : > { %1594 = vmatprep.subr.bf16.mxu0 %v1889_v25 }
  0x99   : > { %v607_v27 = vstv %s318_s10 }
  0x9b   : > { %1595 = vmatpush3.bf16.msra.mxu0 %v1889_v25 }
  0x9c   : > { %1596 = vmatprep.subr.bf16.mxu0 %v1890_v28 }
  0x9d   : > { %1760 = vmatpush3.bf16.xpose.msra.mxu1 %v347_v34 }
  0x9e   : > { %1761 = vmatprep.subr.bf16.mxu1 %v2185_v18 }
  0x9f   : > { %1597 = vmatpush3.bf16.msra.mxu0 %v1890_v28 }
  0xa0   : > { %1598 = vmatprep.subr.bf16.mxu0 %v1891_v30 }
  0xa3   : > { %1599 = vmatpush3.bf16.msra.mxu0 %v1891_v30 }
  0xa4   : > { %1600 = vmatprep.subr.bf16.mxu0 %v1892_v33 }
  0xa5   : > { %1763 = vmatpush3.bf16.xpose.msra.mxu1 %v348_v39 }
  0xa6   : > { %1764 = vmatprep.subr.bf16.mxu1 %v2185_v18 }
  0xa7   : > { %1601 = vmatpush3.bf16.msra.mxu0 %v1892_v33 }
  0xa8   : > { %1645 = vmatprep.subr.bf16.mxu0 %v2443_v35 }
  0xaa   : > { %1603 = vmatmul.mubr.bf16.vlgmr.msra.gmra.mrb[0].mxu0 %v346_v29 }
  0xab   : > { %1606 = vmatprep.mubr.bf16.mxu0 %v347_v34  ;;  %1646 = vmatpush3.bf16.msra.mxu0 %v2443_v35 }
  0xac   : > { %1647 = vmatprep.subr.bf16.mxu0 %v2446_v38 }
  0xad   : > { %1766 = vmatpush3.bf16.xpose.msra.mxu1 %v1765_v43 }
  0xae   : > { %1767 = vmatprep.subr.bf16.mxu1 %v2185_v18 }
  0xaf   : > { %1648 = vmatpush3.bf16.msra.mxu0 %v2446_v38 }
  0xb0   : > { %1649 = vmatprep.subr.bf16.mxu0 %v2451_v42 }
  0xb2   : > { %1607 = vmatmul.mubr.bf16.gmra.mrb[4].mxu0 %v348_v39 }
  0xb3   : > { %1650 = vmatpush3.bf16.msra.mxu0 %v2451_v42 }
  0xb4   : > { %1651 = vmatprep.subr.bf16.mxu0 %v2455_v44 }
  0xb5   : > { %1769 = vmatpush3.bf16.xpose.msra.mxu1 %v1768_v48 }
  0xb6   : > { %1770 = vmatprep.subr.bf16.mxu1 %v2185_v18 }
  0xb7   : > { %1652 = vmatpush3.bf16.msra.mxu0 %v2455_v44 }
  0xb8   : > { %1653 = vmatprep.subr.bf16.mxu0 %v676_v47 }
  0xbb   : > { %1654 = vmatpush3.bf16.msra.mxu0 %v676_v47 }
  0xbc   : > { %1655 = vmatprep.subr.bf16.mxu0 %v677_v49 }
  0xbd   : > { %1772 = vmatpush3.bf16.xpose.msra.mxu1 %v1771_v52 }
  0xbe   : > { %1773 = vmatprep.subr.bf16.mxu1 %v2185_v18 }
  0xbf   : > { %1656 = vmatpush3.bf16.msra.mxu0 %v677_v49 }
  0xc0   : > { %1657 = vmatprep.subr.bf16.mxu0 %v678_v58 }
  0xc3   : > { %1658 = vmatpush3.bf16.msra.mxu0 %v678_v58 }
  0xc4   : > { %1659 = vmatprep.subr.bf16.mxu0 %v679_v60 }
  0xc5   : > { %1775 = vmatpush3.bf16.xpose.msra.mxu1 %v1774_v55 }
  0xc6   : > { %1776 = vmatprep.subr.bf16.mxu1 %v2185_v18 }
  0xc7   : > { %1660 = vmatpush3.bf16.msra.mxu0 %v679_v60 }
  0xcc   : > { %1643 = vmatmul.mubr.f32.vlgmr.msra.gmra.mrb[0].mxu1 %v483_v57 }
  0xcd   : > { %1725 = vmatprep.mubr.msk.f32.mxu1 %vm2186_vm0, %v2187_v19 }
 0x17d   : > { %v1604_v1 = vpop.f32.mrb[0].mxu0 }
 0x17e   : > { %v460_v2 = vadd.f32 %v1604_v1, %v368_v0  ;;  %v451_v3 = vpop.f32.mrb[1].mxu0 }
 0x17f   : > { %v452_v4 = vadd.f32 %v451_v3, %v368_v0  ;;  %v1605_v5 = vpop.f32.mrb[2].mxu0 }
 0x180   : > { %v463_v6 = vadd.f32 %v1605_v5, %v368_v0  ;;  %v454_v7 = vpop.f32.mrb[3].mxu0  ;;  %567 = vperm.xlu1 %1882, %v460_v2  }
 0x181   : > { %v455_v8 = vadd.f32 %v454_v7, %v368_v0  ;;  %557 = vperm.xlu0 %1881, %v452_v4  }
 0x182   : > { %v2477_v9 = vpack.c.bf16 %v463_v6, %v460_v2 }
 0x183   : > { %v2479_v10 = vpack.c.bf16 %v455_v8, %v452_v4 }
 0x184   : > { %572 = vperm.xlu1 %1882, %v463_v6  }
 0x185   : > { %v1608_v11 = vpop.f32.mrb[4].mxu0  ;;  %562 = vperm.xlu0 %1881, %v455_v8   ;;  %1669 = vmatprep.subr.bf16.mxu0 %v2479_v10 }
 0x186   : > { %v467_v12 = vpop.f32.mrb[5].mxu0  ;;  %v476_v15 = vadd.f32 %v1608_v11, %v368_v0 }
 0x187   : > { %v468_v13 = vadd.f32 %v467_v12, %v368_v0  ;;  %v1609_v14 = vpop.f32.mrb[6].mxu0 }
 0x188   : > { %v479_v16 = vadd.f32 %v1609_v14, %v368_v0  ;;  %v470_v17 = vpop.f32.mrb[7].mxu0 }
 0x189   : > { %v471_v20 = vadd.f32 %v470_v17, %v368_v0  ;;  %577 = vperm.xlu0 %1881, %v468_v13  }
 0x18a   : > { %v2482_v21 = vpack.c.bf16 %v479_v16, %v476_v15 }
 0x18b   : > { %582 = vperm.xlu1 %1882, %v471_v20   ;;  %v2484_v22 = vpack.c.bf16 %v471_v20, %v468_v13 }
 0x18d   : > { %587 = vperm.xlu0 %1881, %v476_v15  }
 0x18f   : > { %592 = vperm.xlu1 %1882, %v479_v16  }
 0x193   : > { %1883 = vset.pattern.permute.xlu1 %v2189_v23 }
 0x194   : > { %1008 = vperm.xlu1 %1883, %v452_v4  }
 0x198   : > { %1012 = vperm.xlu1 %1883, %v455_v8  }
 0x19c   : > { %1016 = vperm.xlu1 %1883, %v460_v2  }
 0x19f   : > { %v551_v24 = vpop.f32.mrb[0].mxu1 }
 0x1a0   : > { %1020 = vperm.xlu1 %1883, %v463_v6   ;;  %v1644_v25 = vpop.f32.mrb[1].mxu1  ;;  %v598_v26 = vrot.slane %v551_v24, %v2473_v63 }
 0x1a4   : > { %1024 = vperm.xlu1 %1883, %v468_v13  }
 0x1a8   : > { %1028 = vperm.xlu1 %1883, %v471_v20  }
 0x1ac   : > { %1032 = vperm.xlu1 %1883, %v476_v15  }
 0x1b0   : > { %1036 = vperm.xlu1 %1883, %v479_v16  }
 0x1ff   : > { %v568_v28 = vpop.permute.xlu1 %567 }
 0x200   : > { %v601_v29 = vadd.f32 %v598_v26, %v568_v28  ;;  %v558_v30 = vpop.permute.xlu0 %557 }
 0x201   : > { %v599_v31 = vadd.f32 %v598_v26, %v558_v30  ;;  %v341_v30 = vld [vmem:[#allocation2] sm:$0xff] }
 0x202   : > { %v610_v32 = vadd.f32 %v607_v27, %v601_v29 }
 0x203   : > { %v608_v33 = vadd.f32 %v607_v27, %v599_v31  ;;  %v573_v34 = vpop.permute.xlu1 %572 }
 0x204   : > { %v1466_v36 = vmul.f32 -1.442695, %v610_v32  ;;  %v602_v37 = vadd.f32 %v598_v26, %v573_v34  ;;  %v563_v39 = vpop.permute.xlu0 %562 }
 0x205   : > { %v1464_v40 = vmul.f32 -1.442695, %v608_v33  ;;  %v600_v41 = vadd.f32 %v598_v26, %v563_v39  ;;  %v342_v33 = vld [vmem:[#allocation2 + $0x8] sm:$0xff] }
 0x206   : > { %1893 = vpow2.f32 %v1466_v36  ;;  %v611_v43 = vadd.f32 %v607_v27, %v602_v37 }
 0x207   : > { %1895 = vpow2.f32 %v1464_v40  ;;  %v609_v45 = vadd.f32 %v607_v27, %v600_v41  ;;  %v343_v40 = vld [vmem:[#allocation2 + $0x10] sm:$0xff] }
 0x208   : > { %v1467_v46 = vmul.f32 -1.442695, %v611_v43  ;;  %v578_v47 = vpop.permute.xlu0 %577 }
 0x209   : > { %v1465_v48 = vmul.f32 -1.442695, %v609_v45  ;;  %v603_v49 = vadd.f32 %v598_v26, %v578_v47  ;;  %v344_v47 = vld [vmem:[#allocation2 + $0x18] sm:$0xff] }
 0x20a   : > { %1897 = vpow2.f32 %v1467_v46  ;;  %v583_v50 = vpop.permute.xlu1 %582 }
 0x20b   : > { %1899 = vpow2.f32 %v1465_v48  ;;  %v612_v51 = vadd.f32 %v607_v27, %v603_v49  ;;  %v604_v52 = vadd.f32 %v598_v26, %v583_v50  ;;  %v745_v50 = vunpack.c.l.bf16 %v2443_v35 }
 0x20c   : > { %v588_v53 = vpop.permute.xlu0 %587 }
 0x20d   : > { %v1468_v54 = vmul.f32 -1.442695, %v612_v51  ;;  %v613_v55 = vadd.f32 %v607_v27, %v604_v52  ;;  %v605_v57 = vadd.f32 %v598_v26, %v588_v53  ;;  %v746_v51 = vunpack.c.h.bf16 %v2443_v35 }
 0x20e   : > { %v593_v58 = vpop.permute.xlu1 %592 }
 0x20f   : > { %1901 = vpow2.f32 %v1468_v54  ;;  %v1469_v59 = vmul.f32 -1.442695, %v613_v55  ;;  %v614_v60 = vadd.f32 %v607_v27, %v605_v57  ;;  %v606_v61 = vadd.f32 %v598_v26, %v593_v58 }
 0x210   : > { %v1894_v0 = vpop.eup %1893  ;;  %v748_v57 = vunpack.c.h.bf16 %v2446_v38 }
 0x211   : > { %v1896_v1 = vpop.eup %1895  ;;  %v642_v2 = vadd.f32 1.0, %v1894_v0  ;;  %1903 = vpow2.f32 %v1469_v59  ;;  %v1470_v3 = vmul.f32 -1.442695, %v614_v60  ;;  %v615_v4 = vadd.f32 %v607_v27, %v606_v61 }
 0x212   : > { %v640_v5 = vadd.f32 1.0, %v1896_v1 }
 0x213   : > { %1905 = vrcp.f32 %v642_v2  ;;  %v1471_v6 = vmul.f32 -1.442695, %v615_v4  ;;  %v750_v2 = vunpack.c.h.bf16 %v2451_v42  ;;  %v751_v4 = vunpack.c.l.bf16 %v2455_v44 }
 0x214   : > { %v1898_v7 = vpop.eup %1897  ;;  %1907 = vrcp.f32 %v640_v5 }
 0x215   : > { %v1900_v8 = vpop.eup %1899  ;;  %v643_v11 = vadd.f32 1.0, %v1898_v7  ;;  %1909 = vpow2.f32 %v1470_v3 }
 0x216   : > { %v641_v12 = vadd.f32 1.0, %v1900_v8  ;;  %1911 = vpow2.f32 %v1471_v6 }
 0x217   : > { %1913 = vrcp.f32 %v643_v11  ;;  %v752_v11 = vunpack.c.h.bf16 %v2455_v44 }
 0x218   : > { %1915 = vrcp.f32 %v641_v12 }
 0x219   : > { %v1902_v13 = vpop.eup %1901 }
 0x21a   : > { %v644_v14 = vadd.f32 1.0, %v1902_v13 }
 0x21b   : > { %v1904_v15 = vpop.eup %1903 }
 0x21c   : > { %v645_v16 = vadd.f32 1.0, %v1904_v15  ;;  %1917 = vrcp.f32 %v644_v14 }
 0x21d   : > { %v1906_v17 = vpop.eup %1905 }
 0x21e   : > { %v1908_v20 = vpop.eup %1907  ;;  %1919 = vrcp.f32 %v645_v16 }
 0x21f   : > { %v1910_v24 = vpop.eup %1909 }
 0x220   : > { %v1912_v25 = vpop.eup %1911  ;;  %v646_v26 = vadd.f32 1.0, %v1910_v24 }
 0x221   : > { %v1914_v27 = vpop.eup %1913  ;;  %v647_v28 = vadd.f32 1.0, %v1912_v25 }
 0x222   : > { %v1916_v29 = vpop.eup %1915  ;;  %1921 = vrcp.f32 %v646_v26  ;;  %v665_v31 = vpack.c.bf16 %v1914_v27, %v1906_v17 }
 0x223   : > { %1923 = vrcp.f32 %v647_v28  ;;  %v664_v32 = vpack.c.bf16 %v1916_v29, %v1908_v20 }
 0x224   : > { %v669_v36 = vmul.bf16 %v665_v31, %v342_v33 }
 0x225   : > { %v668_v34 = vmul.bf16 %v664_v32, %v341_v30 }
 0x226   : > { %v1918_v37 = vpop.eup %1917 }
 0x227   : > { %1661 = vmatprep.mubr.bf16.mxu0 %v668_v34 }
 0x228   : > { %v1920_v39 = vpop.eup %1919  ;;  %1662 = vmatmul.mubr.bf16.vlgmr.msra.gmra.mrb[8].mxu0 %v669_v36 }
 0x229   : > { %1670 = vmatpush3.bf16.msra.mxu0 %v2479_v10  ;;  %v666_v41 = vpack.c.bf16 %v1920_v39, %v1918_v37 }
 0x22a   : > { %1671 = vmatprep.subr.bf16.mxu0 %v2477_v9 }
 0x22b   : > { %v670_v43 = vmul.bf16 %v666_v41, %v343_v40 }
 0x22c   : > { %v1922_v45 = vpop.eup %1921 }
 0x22d   : > { %v1924_v46 = vpop.eup %1923  ;;  %1672 = vmatpush3.bf16.msra.mxu0 %v2477_v9  ;;  %1665 = vmatprep.mubr.bf16.mxu0 %v670_v43  ;;  %v747_v9 = vunpack.c.l.bf16 %v2446_v38 }
 0x22e   : > { %1673 = vmatprep.subr.bf16.mxu0 %v2484_v22  ;;  %v667_v48 = vpack.c.bf16 %v1924_v46, %v1922_v45 }
 0x230   : > { %v671_v49 = vmul.bf16 %v667_v48, %v344_v47 }
 0x231   : > { %1674 = vmatpush3.bf16.msra.mxu0 %v2484_v22 }
 0x232   : > { %1666 = vmatmul.mubr.bf16.gmra.mrb[12].mxu0 %v671_v49  ;;  %1675 = vmatprep.subr.bf16.mxu0 %v2482_v21 }
 0x235   : > { %1676 = vmatpush3.bf16.msra.mxu0 %v2482_v21  ;;  %v749_v21 = vunpack.c.l.bf16 %v2451_v42 }
 0x2fb   : > { %v1663_v10 = vpop.f32.mrb[8].mxu0 }
 0x2fc   : > { %v714_v52 = vpop.f32.mrb[9].mxu0  ;;  %v755_v22 = vmul.f32 %v1663_v10, %v747_v9 }
 0x2fd   : > { %v1664_v53 = vpop.f32.mrb[10].mxu0  ;;  %v753_v55 = vmul.f32 %v745_v50, %v714_v52 }
 0x2fe   : > { %v717_v54 = vpop.f32.mrb[11].mxu0  ;;  %v756_v60 = vmul.f32 %v1664_v53, %v748_v57 }
 0x2ff   : > { %v754_v58 = vmul.f32 %v746_v51, %v717_v54 }
 0x301   : > { %v761_v59 = vadd.f32 %v754_v58, %v753_v55 }
 0x303   : > { %v762_v61 = vadd.f32 %v761_v59, %v755_v22 }
 0x305   : > { %v1667_v0 = vpop.f32.mrb[12].mxu0  ;;  %v763_v1 = vadd.f32 %v762_v61, %v756_v60 }
 0x306   : > { %v730_v3 = vpop.f32.mrb[13].mxu0  ;;  %v759_v13 = vmul.f32 %v1667_v0, %v751_v4 }
 0x307   : > { %v757_v5 = vmul.f32 %v749_v21, %v730_v3  ;;  %v1668_v6 = vpop.f32.mrb[14].mxu0 }
 0x308   : > { %v733_v7 = vpop.f32.mrb[15].mxu0  ;;  %v760_v15 = vmul.f32 %v1668_v6, %v752_v11 }
 0x309   : > { %v764_v8 = vadd.f32 %v763_v1, %v757_v5  ;;  %v758_v12 = vmul.f32 %v750_v2, %v733_v7 }
 0x30b   : > { %v765_v14 = vadd.f32 %v764_v8, %v758_v12 }
 0x30d   : > { %v766_v16 = vadd.f32 %v765_v14, %v759_v13 }
 0x30f   : > { %v767_v17 = vadd.f32 %v766_v16, %v760_v15 }
 0x311   : > { %v768_v20 = vrot.slane %v767_v17, 4 }
 0x313   : > { %v769_v24 = vadd.f32 %v768_v20, %v767_v17  ;;  %v935_v20 = vrot.slane %v2464_v56, 2 }
 0x315   : > { %v770_v25 = vrot.slane %v769_v24, 2 }
 0x317   : > { %v771_v26 = vadd.f32 %v770_v25, %v769_v24  ;;  %v1009_v24 = vpop.permute.xlu1 %1008 }
 0x319   : > { %v772_v27 = vrot.slane %v771_v26, 1 }
 0x31b   : > { %v773_v28 = vadd.f32 %v772_v27, %v771_v26  ;;  %v1013_v25 = vpop.permute.xlu1 %1012 }
 0x31d   : > { %vm774_vm1 = vcmp.ne.f32.partialorder %v773_v28, 0.0 }
 0x31e   : > { %v1472_v29 = vsel %vm774_vm1, 1.0, %v2187_v19 }
 0x31f   : > { %v777_v30 = vsub.f32 1.0, %v1472_v29  ;;  %v1017_v26 = vpop.permute.xlu1 %1016 }
 0x321   : > { %v778_v31 = vadd.f32 %v777_v30, %v773_v28 }
 0x323   : > { %1925 = vrcp.f32 %v778_v31  ;;  %v1021_v27 = vpop.permute.xlu1 %1020 }
 0x327   : > { %v1025_v28 = vpop.permute.xlu1 %1024 }
 0x32d   : > { %v1926_v32 = vpop.eup %1925 }
 0x32e   : > { %v780_v33 = vmul.f32 %v1926_v32, %v1472_v29  ;;  %v1029_v29 = vpop.permute.xlu1 %1028 }
 0x330   : > { %v785_v34 = vmul.f32 %v780_v33, %v757_v5  ;;  %v786_v36 = vmul.f32 %v780_v33, %v758_v12  ;;  %v781_v37 = vmul.f32 %v780_v33, %v753_v55  ;;  %v782_v39 = vmul.f32 %v780_v33, %v754_v58 }
 0x331   : > { %v783_v40 = vmul.f32 %v780_v33, %v755_v22  ;;  %v784_v41 = vmul.f32 %v780_v33, %v756_v60  ;;  %v787_v43 = vmul.f32 %v780_v33, %v759_v13  ;;  %v788_v45 = vmul.f32 %v780_v33, %v760_v15 }
 0x332   : > { %v791_v46 = vpack.c.bf16 %v786_v36, %v785_v34  ;;  %v789_v47 = vpack.c.bf16 %v782_v39, %v781_v37  ;;  %v1033_v30 = vpop.permute.xlu1 %1032  ;;  %v1051_v34 = vstv %s320_s9 }
 0x333   : > { %v790_v48 = vpack.c.bf16 %v784_v41, %v783_v40  ;;  %v792_v49 = vpack.c.bf16 %v788_v45, %v787_v43 }
 0x334   : > { %797 = vxpose.xlu0.c.b16.start [1/4] (short) %v789_v47, 128 }
 0x338   : > { %798 = vxpose.xlu0.c.b16.cont [2/4] (short) %v790_v48, 128 }
 0x33c   : > { %799 = vxpose.xlu0.c.b16.cont [3/4] (short) %v791_v46, 128 }
 0x340   : > { %800 = vxpose.xlu0.c.b16.end [4/4] (short) %v792_v49, 128 }
 0x349   : > { %1884 = vset.pattern.permute.xlu0 %v2189_v23 }
 0x39a   : > { %v805_v10 = vpop.trf.xlu0 }
 0x39b   : > { %1677 = vmatprep.mubr.msk.bf16.mxu0 %vm813_vm2, %v805_v10 }
 0x39e   : > { %v806_v50 = vpop.trf.xlu0 }
 0x39f   : > { %1678 = vmatmul.mubr.msk.bf16.vlgmr.msra.gmra.mrb[16].mxu0 %vm813_vm2, %v806_v50 }
 0x3a2   : > { %v807_v51 = vpop.trf.xlu0 }
 0x3a3   : > { %1681 = vmatprep.mubr.msk.bf16.mxu0 %vm813_vm2, %v807_v51 }
 0x3a6   : > { %v808_v52 = vpop.trf.xlu0 }
 0x3a7   : > { %1682 = vmatmul.mubr.msk.bf16.gmra.mrb[20].mxu0 %vm813_vm2, %v808_v52 }
 0x3aa   : > { %v809_v9 = vpop.trf.xlu0 }
 0x3ab   : > { %1685 = vmatprep.mubr.msk.bf16.mxu0 %vm813_vm2, %v809_v9 }
 0x3ae   : > { %v810_v53 = vpop.trf.xlu0 }
 0x3af   : > { %1686 = vmatmul.mubr.msk.bf16.gmra.mrb[24].mxu0 %vm813_vm2, %v810_v53 }
 0x3b2   : > { %v811_v23 = vpop.trf.xlu0 }
 0x3b3   : > { %1689 = vmatprep.mubr.msk.bf16.mxu0 %vm813_vm2, %v811_v23 }
 0x3b6   : > { %v812_v54 = vpop.trf.xlu0 }
 0x3b7   : > { %1690 = vmatmul.mubr.msk.bf16.gmra.mrb[28].mxu0 %vm813_vm2, %v812_v54 }
 0x472   : > { %v1679_v55 = vpop.f32.mrb[16].mxu0 }
 0x473   : > { %v872_v57 = vpop.f32.mrb[17].mxu0 }
 0x474   : > { %v1680_v58 = vpop.f32.mrb[18].mxu0 }
 0x475   : > { %v1780_v22 = vpack.c.bf16 %v1680_v58, %v1679_v55  ;;  %v875_v59 = vpop.f32.mrb[19].mxu0 }
 0x476   : > { %v1777_v60 = vpack.c.bf16 %v875_v59, %v872_v57 }
 0x478   : > { %1778 = vmatpush3.bf16.xpose.msra.mxu1 %v1777_v60  ;;  %1728 = vmatprep.subr.bf16.mxu0 %v1777_v60 }
 0x479   : > { %1729 = vmatpush3.bf16.msra.mxu0 %v1777_v60  ;;  %1779 = vmatprep.subr.bf16.mxu1 %v2185_v18 }
 0x47a   : > { %v1683_v61 = vpop.f32.mrb[20].mxu0  ;;  %1730 = vmatprep.subr.bf16.mxu0 %v1780_v22 }
 0x47b   : > { %v888_v21 = vpop.f32.mrb[21].mxu0 }
 0x47c   : > { %v1684_v0 = vpop.f32.mrb[22].mxu0 }
 0x47d   : > { %v1786_v1 = vpack.c.bf16 %v1684_v0, %v1683_v61  ;;  %v891_v2 = vpop.f32.mrb[23].mxu0  ;;  %1731 = vmatpush3.bf16.msra.mxu0 %v1780_v22 }
 0x47e   : > { %v1783_v3 = vpack.c.bf16 %v891_v2, %v888_v21 }
 0x480   : > { %1781 = vmatpush3.bf16.xpose.msra.mxu1 %v1780_v22  ;;  %1732 = vmatprep.subr.bf16.mxu0 %v1783_v3 }
 0x481   : > { %1733 = vmatpush3.bf16.msra.mxu0 %v1783_v3  ;;  %1782 = vmatprep.subr.bf16.mxu1 %v2185_v18 }
 0x482   : > { %1734 = vmatprep.subr.bf16.mxu0 %v1786_v1  ;;  %v1687_v4 = vpop.f32.mrb[24].mxu0 }
 0x483   : > { %v904_v5 = vpop.f32.mrb[25].mxu0 }
 0x484   : > { %v1688_v6 = vpop.f32.mrb[26].mxu0 }
 0x485   : > { %1735 = vmatpush3.bf16.msra.mxu0 %v1786_v1  ;;  %v1792_v7 = vpack.c.bf16 %v1688_v6, %v1687_v4  ;;  %v907_v8 = vpop.f32.mrb[27].mxu0 }
 0x486   : > { %v1789_v11 = vpack.c.bf16 %v907_v8, %v904_v5 }
 0x488   : > { %1784 = vmatpush3.bf16.xpose.msra.mxu1 %v1783_v3  ;;  %1736 = vmatprep.subr.bf16.mxu0 %v1789_v11 }
 0x489   : > { %1785 = vmatprep.subr.bf16.mxu1 %v2185_v18  ;;  %1737 = vmatpush3.bf16.msra.mxu0 %v1789_v11 }
 0x48a   : > { %1738 = vmatprep.subr.bf16.mxu0 %v1792_v7  ;;  %v1691_v12 = vpop.f32.mrb[28].mxu0 }
 0x48b   : > { %v920_v13 = vpop.f32.mrb[29].mxu0 }
 0x48c   : > { %v1692_v14 = vpop.f32.mrb[30].mxu0 }
 0x48d   : > { %1739 = vmatpush3.bf16.msra.mxu0 %v1792_v7  ;;  %v1798_v15 = vpack.c.bf16 %v1692_v14, %v1691_v12  ;;  %v923_v16 = vpop.f32.mrb[31].mxu0 }
 0x48e   : > { %v1795_v17 = vpack.c.bf16 %v923_v16, %v920_v13 }
 0x490   : > { %1787 = vmatpush3.bf16.xpose.msra.mxu1 %v1786_v1  ;;  %1740 = vmatprep.subr.bf16.mxu0 %v1795_v17 }
 0x491   : > { %1788 = vmatprep.subr.bf16.mxu1 %v2185_v18  ;;  %1741 = vmatpush3.bf16.msra.mxu0 %v1795_v17 }
 0x492   : > { %1742 = vmatprep.subr.bf16.mxu0 %v1798_v15 }
 0x495   : > { %1743 = vmatpush3.bf16.msra.mxu0 %v1798_v15 }
 0x498   : > { %1790 = vmatpush3.bf16.xpose.msra.mxu1 %v1789_v11 }
 0x499   : > { %1791 = vmatprep.subr.bf16.mxu1 %v2185_v18 }
 0x4a0   : > { %1793 = vmatpush3.bf16.xpose.msra.mxu1 %v1792_v7 }
 0x4a1   : > { %1794 = vmatprep.subr.bf16.mxu1 %v2185_v18 }
 0x4a8   : > { %1796 = vmatpush3.bf16.xpose.msra.mxu1 %v1795_v17 }
 0x4a9   : > { %1797 = vmatprep.subr.bf16.mxu1 %v2185_v18  ;;  %v1037_v18 = vpop.permute.xlu1 %1036 }
 0x4b0   : > { %1799 = vmatpush3.bf16.xpose.msra.mxu1 %v1798_v15 }
 0x4b7   : > { %1726 = vmatmul.mubr.f32.vlgmr.msra.gmra.mrb[2].mxu1 %v935_v20 }
 0x58a   : > { %v1003_v31 = vpop.f32.mrb[2].mxu1 }
 0x58b   : > { %v1042_v32 = vrot.slane %v1003_v31, %v2473_v63  ;;  %v1727_v33 = vpop.f32.mrb[3].mxu1 }
 0x58d   : > { %v1043_v36 = vadd.f32 %v1042_v32, %v1009_v24  ;;  %v1044_v37 = vadd.f32 %v1042_v32, %v1013_v25  ;;  %v1045_v39 = vadd.f32 %v1042_v32, %v1017_v26  ;;  %v1046_v40 = vadd.f32 %v1042_v32, %v1021_v27 }
 0x58e   : > { %v1047_v41 = vadd.f32 %v1042_v32, %v1025_v28  ;;  %v1048_v43 = vadd.f32 %v1042_v32, %v1029_v29  ;;  %v1049_v45 = vadd.f32 %v1042_v32, %v1033_v30  ;;  %v1050_v46 = vadd.f32 %v1042_v32, %v1037_v18 }
 0x58f   : > { %v1052_v47 = vadd.f32 %v1051_v34, %v1043_v36  ;;  %v1053_v48 = vadd.f32 %v1051_v34, %v1044_v37  ;;  %v1054_v49 = vadd.f32 %v1051_v34, %v1045_v39  ;;  %v1055_v10 = vadd.f32 %v1051_v34, %v1046_v40 }
 0x590   : > { %v1056_v50 = vadd.f32 %v1051_v34, %v1047_v41  ;;  %v1057_v51 = vadd.f32 %v1051_v34, %v1048_v43  ;;  %v1058_v52 = vadd.f32 %v1051_v34, %v1049_v45  ;;  %v1059_v9 = vadd.f32 %v1051_v34, %v1050_v46 }
 0x591   : > { %v1481_v63 = vmul.f32 -1.442695, %v1052_v47  ;;  %v1482_v53 = vmul.f32 -1.442695, %v1053_v48  ;;  %v1483_v23 = vmul.f32 -1.442695, %v1054_v49 }
 0x592   : > { %v1484_v54 = vmul.f32 -1.442695, %v1055_v10  ;;  %v1485_v55 = vmul.f32 -1.442695, %v1056_v50  ;;  %v1486_v57 = vmul.f32 -1.442695, %v1057_v51 }
 0x593   : > { %1927 = vpow2.f32 %v1481_v63  ;;  %v1487_v58 = vmul.f32 -1.442695, %v1058_v52  ;;  %v1488_v22 = vmul.f32 -1.442695, %v1059_v9 }
 0x594   : > { %1929 = vpow2.f32 %v1482_v53 }
 0x595   : > { %1931 = vpow2.f32 %v1483_v23 }
 0x596   : > { %1933 = vpow2.f32 %v1484_v54 }
 0x597   : > { %1935 = vpow2.f32 %v1485_v55 }
 0x598   : > { %1937 = vpow2.f32 %v1486_v57 }
 0x599   : > { %1939 = vpow2.f32 %v1487_v58 }
 0x59a   : > { %1941 = vpow2.f32 %v1488_v22 }
 0x59d   : > { %v1928_v59 = vpop.eup %1927 }
 0x59e   : > { %v1930_v60 = vpop.eup %1929  ;;  %v1084_v61 = vadd.f32 1.0, %v1928_v59 }
 0x59f   : > { %v1932_v21 = vpop.eup %1931  ;;  %v1085_v0 = vadd.f32 1.0, %v1930_v60 }
 0x5a0   : > { %v1934_v1 = vpop.eup %1933  ;;  %1943 = vrcp.f32 %v1084_v61  ;;  %v1086_v2 = vadd.f32 1.0, %v1932_v21 }
 0x5a1   : > { %v1936_v3 = vpop.eup %1935  ;;  %1945 = vrcp.f32 %v1085_v0  ;;  %v1087_v4 = vadd.f32 1.0, %v1934_v1 }
 0x5a2   : > { %v1938_v5 = vpop.eup %1937  ;;  %1947 = vrcp.f32 %v1086_v2  ;;  %v1088_v6 = vadd.f32 1.0, %v1936_v3 }
 0x5a3   : > { %v1940_v7 = vpop.eup %1939  ;;  %1949 = vrcp.f32 %v1087_v4  ;;  %v1089_v8 = vadd.f32 1.0, %v1938_v5 }
 0x5a4   : > { %v1942_v11 = vpop.eup %1941  ;;  %1951 = vrcp.f32 %v1088_v6  ;;  %v1090_v12 = vadd.f32 1.0, %v1940_v7 }
 0x5a5   : > { %1953 = vrcp.f32 %v1089_v8  ;;  %v1091_v13 = vadd.f32 1.0, %v1942_v11 }
 0x5a6   : > { %1955 = vrcp.f32 %v1090_v12  ;;  %v1295_v12 = vsub.s32 3, %v2470_v62 }
 0x5a7   : > { %1957 = vrcp.f32 %v1091_v13 }
 0x5aa   : > { %v1944_v14 = vpop.eup %1943 }
 0x5ab   : > { %v1946_v15 = vpop.eup %1945 }
 0x5ac   : > { %v1948_v16 = vpop.eup %1947  ;;  %v1108_v17 = vpack.c.bf16 %v1946_v15, %v1944_v14 }
 0x5ad   : > { %v1950_v20 = vpop.eup %1949 }
 0x5ae   : > { %v1952_v24 = vpop.eup %1951  ;;  %v1112_v25 = vmul.bf16 %v1108_v17, %v2443_v35  ;;  %v1109_v26 = vpack.c.bf16 %v1950_v20, %v1948_v16  ;;  %v1307_v16 = vsub.s32 4, %v2470_v62 }
 0x5af   : > { %v1954_v27 = vpop.eup %1953 }
 0x5b0   : > { %v1956_v28 = vpop.eup %1955  ;;  %1744 = vmatprep.mubr.bf16.mxu0 %v1112_v25  ;;  %v1113_v29 = vmul.bf16 %v1109_v26, %v2446_v38  ;;  %v1110_v30 = vpack.c.bf16 %v1954_v27, %v1952_v24  ;;  %v1117_v31 = vunpack.c.h.bf16 %v1112_v25  ;;  %v1116_v32 = vunpack.c.l.bf16 %v1112_v25 }
 0x5b1   : > { %v1958_v33 = vpop.eup %1957  ;;  %v1308_v62 = vrot.slane %v2464_v56, %v1307_v16 }
 0x5b2   : > { %1745 = vmatmul.mubr.bf16.vlgmr.msra.gmra.mrb[32].mxu0 %v1113_v29  ;;  %v1114_v34 = vmul.bf16 %v1110_v30, %v2451_v42  ;;  %1126 = vadd.xlane.f32.xlu0 %v1117_v31  ;;  %v1111_v18 = vpack.c.bf16 %v1958_v33, %v1956_v28  ;;  %v1119_v36 = vunpack.c.h.bf16 %v1113_v29  ;;  %v1118_v37 = vunpack.c.l.bf16 %v1113_v29  ;;  %v1975_v29 = vld [vmem:[#allocation12 + $0x10] sm:$0xff] }
 0x5b3   : > { %1124 = vadd.xlane.f32.xlu1 %v1116_v32  ;;  %v2548_v28 = vrot.slane %v2464_v56, %v1295_v12 }
 0x5b4   : > { %1748 = vmatprep.mubr.bf16.mxu0 %v1114_v34  ;;  %v1115_v35 = vmul.bf16 %v1111_v18, %v2455_v44  ;;  %v1121_v39 = vunpack.c.h.bf16 %v1114_v34  ;;  %v1120_v40 = vunpack.c.l.bf16 %v1114_v34  ;;  %v1976_v34 = vld [vmem:[#allocation12] sm:$0xff] }
 0x5b6   : > { %1130 = vadd.xlane.f32.xlu0 %v1119_v36  ;;  %v1123_v38 = vunpack.c.h.bf16 %v1115_v35  ;;  %v1122_v41 = vunpack.c.l.bf16 %v1115_v35 }
 0x5b7   : > { %1128 = vadd.xlane.f32.xlu1 %v1118_v37 }
 0x5ba   : > { %1749 = vmatmul.mubr.bf16.gmra.mrb[36].mxu0 %v1115_v35  ;;  %1134 = vadd.xlane.f32.xlu0 %v1121_v39  ;;  %v1977_v39 = vld [vmem:[#allocation12 + $0x18] sm:$0xff] }
 0x5bb   : > { %1132 = vadd.xlane.f32.xlu1 %v1120_v40 }
 0x5be   : > { %1138 = vadd.xlane.f32.xlu0 %v1123_v38 }
 0x5bf   : > { %1136 = vadd.xlane.f32.xlu1 %v1122_v41 }
 0x63f   : > { %v1127_v43 = vpop.xlane.xlu0 %1126 }
 0x640   : > { %v1125_v42 = vpop.xlane.xlu1 %1124  ;;  %vm1141_vm6 = vcmp.ne.f32.partialorder %v1127_v43, 0.0 }
 0x641   : > { %vm1140_vm4 = vcmp.ne.f32.partialorder %v1125_v42, 0.0  ;;  %v1490_v51 = vsel %vm1141_vm6, 1.0, %v2187_v19 }
 0x642   : > { %v1489_v49 = vsel %vm1140_vm4, 1.0, %v2187_v19  ;;  %v1238_v23 = vsub.f32 1.0, %v1490_v51 }
 0x643   : > { %v1131_v46 = vpop.xlane.xlu0 %1130  ;;  %v1237_v9 = vsub.f32 1.0, %v1489_v49 }
 0x644   : > { %v1129_v45 = vpop.xlane.xlu1 %1128  ;;  %vm1143_vm5 = vcmp.ne.f32.partialorder %v1131_v46, 0.0  ;;  %v1246_v59 = vadd.f32 %v1238_v23, %v1127_v43 }
 0x645   : > { %vm1142_vm3 = vcmp.ne.f32.partialorder %v1129_v45, 0.0  ;;  %v1492_v10 = vsel %vm1143_vm5, 1.0, %v2187_v19  ;;  %v1245_v55 = vadd.f32 %v1237_v9, %v1125_v42  ;;  %v1978_v42 = vld [vmem:[#allocation12 + $0x8] sm:$0xff] }
 0x646   : > { %v1491_v44 = vsel %vm1142_vm3, 1.0, %v2187_v19  ;;  %v1240_v53 = vsub.f32 1.0, %v1492_v10 }
 0x647   : > { %v1135_v48 = vpop.xlane.xlu0 %1134  ;;  %v1239_v52 = vsub.f32 1.0, %v1491_v44 }
 0x648   : > { %v1133_v47 = vpop.xlane.xlu1 %1132  ;;  %vm1145_vm10 = vcmp.ne.f32.partialorder %v1135_v48, 0.0  ;;  %v1248_v58 = vadd.f32 %v1240_v53, %v1131_v46 }
 0x649   : > { %vm1144_vm8 = vcmp.ne.f32.partialorder %v1133_v47, 0.0  ;;  %v1247_v54 = vadd.f32 %v1239_v52, %v1129_v45  ;;  %v2541_v61 = vsel %vm1145_vm10, 1.0, %v2187_v19 }
 0x64a   : > { %v1493_v22 = vsel %vm1144_vm8, 1.0, %v2187_v19  ;;  %v1242_v2 = vsub.f32 1.0, %v2541_v61 }
 0x64b   : > { %v1139_v63 = vpop.xlane.xlu0 %1138  ;;  %1959 = vrcp.f32 %v1247_v54  ;;  %v1241_v0 = vsub.f32 1.0, %v1493_v22 }
 0x64c   : > { %v1137_v50 = vpop.xlane.xlu1 %1136  ;;  %vm1147_vm9 = vcmp.ne.f32.partialorder %v1139_v63, 0.0  ;;  %1961 = vrcp.f32 %v1245_v55  ;;  %v1250_v6 = vadd.f32 %v1242_v2, %v1135_v48 }
 0x64d   : > { %vm1146_vm7 = vcmp.ne.f32.partialorder %v1137_v50, 0.0  ;;  %v2538_v60 = vsel %vm1147_vm9, 1.0, %v2187_v19  ;;  %1963 = vrcp.f32 %v1248_v58  ;;  %v1249_v4 = vadd.f32 %v1241_v0, %v1133_v47 }
 0x64e   : > { %v1495_v57 = vsel %vm1146_vm7, 1.0, %v2187_v19  ;;  %v1244_v1 = vsub.f32 1.0, %v2538_v60  ;;  %1965 = vrcp.f32 %v1246_v59 }
 0x64f   : > { %v1243_v21 = vsub.f32 1.0, %v1495_v57 }
 0x650   : > { %v1252_v5 = vadd.f32 %v1244_v1, %v1139_v63 }
 0x651   : > { %v1251_v3 = vadd.f32 %v1243_v21, %v1137_v50  ;;  %v1979_v21 = vld [vmem:[#allocation12 + $0x30] sm:$0xff] }
 0x653   : > { %1967 = vrcp.f32 %v1251_v3 }
 0x654   : > { %1969 = vrcp.f32 %v1249_v4  ;;  %v1980_v4 = vld [vmem:[#allocation12 + $0x20] sm:$0xff] }
 0x655   : > { %v1960_v7 = vpop.eup %1959  ;;  %1971 = vrcp.f32 %v1252_v5 }
 0x656   : > { %v1962_v8 = vpop.eup %1961  ;;  %1973 = vrcp.f32 %v1250_v6  ;;  %v1263_v13 = vmul.f32 %v1960_v7, %v1491_v44 }
 0x657   : > { %v1964_v19 = vpop.eup %1963  ;;  %v1261_v15 = vmul.f32 %v1962_v8, %v1489_v49  ;;  %v1981_v8 = vld [vmem:[#allocation12 + $0x38] sm:$0xff] }
 0x658   : > { %v1966_v11 = vpop.eup %1965  ;;  %v1264_v24 = vmul.f32 %v1964_v19, %v1492_v10 }
 0x659   : > { %v1262_v27 = vmul.f32 %v1966_v11, %v1490_v51 }
 0x65d   : > { %v1968_v33 = vpop.eup %1967 }
 0x65e   : > { %v1970_v37 = vpop.eup %1969  ;;  %v1267_v48 = vmul.f32 %v1968_v33, %v1495_v57 }
 0x65f   : > { %v1972_v38 = vpop.eup %1971  ;;  %v1265_v50 = vmul.f32 %v1970_v37, %v1493_v22 }
 0x660   : > { %v1974_v45 = vpop.eup %1973  ;;  %v1268_v63 = vmul.f32 %v1972_v38, %v2538_v60 }
 0x661   : > { %v1266_v58 = vmul.f32 %v1974_v45, %v2541_v61  ;;  %v1982_v61 = vld [vmem:[#allocation12 + $0x28] sm:$0xff] }
 0x685   : > { %v1746_v14 = vpop.f32.mrb[32].mxu0 }
 0x686   : > { %v1271_v17 = vmul.f32 %v1746_v14, %v1263_v13  ;;  %v1206_v20 = vpop.f32.mrb[33].mxu0 }
 0x687   : > { %v1269_v25 = vmul.f32 %v1261_v15, %v1206_v20  ;;  %v1747_v26 = vpop.f32.mrb[34].mxu0 }
 0x688   : > { %v1279_v30 = vadd.f32 %v1975_v29, %v1271_v17  ;;  %v1272_v31 = vmul.f32 %v1747_v26, %v1264_v24  ;;  %v1209_v32 = vpop.f32.mrb[35].mxu0 }
 0x689   : > { %v1277_v18 = vadd.f32 %v1976_v34, %v1269_v25  ;;  %v1270_v36 = vmul.f32 %v1262_v27, %v1209_v32 }
 0x68a   : > { %v1287_v35 = vmax.f32 %v1279_v30, 0.0  ;;  %v1280_v40 = vadd.f32 %v1977_v39, %v1272_v31 }
 0x68b   : > { %v1285_v41 = vmax.f32 %v1277_v18, 0.0  ;;  %v1278_v43 = vadd.f32 %v1978_v42, %v1270_v36 }
 0x68c   : > { %v1299_v46 = vmul.f32 %v2548_v28, %v1287_v35  ;;  %v1288_v47 = vmax.f32 %v1280_v40, 0.0 }
 0x68d   : > { %v1297_v44 = vmul.f32 %v2548_v28, %v1285_v41  ;;  %v1286_v49 = vmax.f32 %v1278_v43, 0.0  ;;  %v1750_v10 = vpop.f32.mrb[36].mxu0 }
 0x68e   : > { %v1311_v51 = vadd.f32 %v1308_v62, %v1299_v46  ;;  %v1300_v56 = vmul.f32 %v2548_v28, %v1288_v47  ;;  %v1275_v52 = vmul.f32 %v1750_v10, %v1267_v48  ;;  %v1222_v9 = vpop.f32.mrb[37].mxu0 }
 0x68f   : > { %v1309_v53 = vadd.f32 %v1308_v62, %v1297_v44  ;;  %v1298_v23 = vmul.f32 %v2548_v28, %v1286_v49  ;;  %v1273_v54 = vmul.f32 %v1265_v50, %v1222_v9  ;;  %v1751_v55 = vpop.f32.mrb[38].mxu0 }
 0x690   : > { %v1319_v57 = vmax.f32 %v1311_v51, 0.0  ;;  %v1312_v59 = vadd.f32 %v1308_v62, %v1300_v56  ;;  %v1283_v0 = vadd.f32 %v1979_v21, %v1275_v52  ;;  %v1276_v1 = vmul.f32 %v1751_v55, %v1268_v63  ;;  %v1225_v22 = vpop.f32.mrb[39].mxu0 }
 0x691   : > { %v1317_v2 = vmax.f32 %v1309_v53, 0.0  ;;  %v1310_v3 = vadd.f32 %v1308_v62, %v1298_v23  ;;  %v1281_v5 = vadd.f32 %v1980_v4, %v1273_v54  ;;  %v1274_v6 = vmul.f32 %v1266_v58, %v1225_v22 }
 0x692   : > { %1327 = vst [vmem:[#allocation12 + $0x10] sm:$0xff] %v1319_v57  ;;  %v1320_v60 = vmax.f32 %v1312_v59, 0.0  ;;  %v1291_v7 = vmax.f32 %v1283_v0, 0.0  ;;  %v1284_v19 = vadd.f32 %v1981_v8, %v1276_v1 }
 0x693   : > { %1325 = vst [vmem:[#allocation12] sm:$0xff] %v1317_v2  ;;  %v1318_v11 = vmax.f32 %v1310_v3, 0.0  ;;  %v1289_v12 = vmax.f32 %v1281_v5, 0.0  ;;  %v1282_v13 = vadd.f32 %v1982_v61, %v1274_v6 }
 0x694   : > { %1328 = vst [vmem:[#allocation12 + $0x18] sm:$0xff] %v1320_v60  ;;  %v1303_v14 = vmul.f32 %v2548_v28, %v1291_v7  ;;  %v1292_v15 = vmax.f32 %v1284_v19, 0.0 }
 0x695   : > { %1326 = vst [vmem:[#allocation12 + $0x8] sm:$0xff] %v1318_v11  ;;  %v1301_v16 = vmul.f32 %v2548_v28, %v1289_v12  ;;  %v1290_v17 = vmax.f32 %v1282_v13, 0.0 }
 0x696   : > { %v1315_v20 = vadd.f32 %v1308_v62, %v1303_v14  ;;  %v1304_v24 = vmul.f32 %v2548_v28, %v1292_v15 }
 0x697   : > { %v1313_v25 = vadd.f32 %v1308_v62, %v1301_v16  ;;  %v1302_v26 = vmul.f32 %v2548_v28, %v1290_v17 }
 0x698   : > { %v1323_v27 = vmax.f32 %v1315_v20, 0.0  ;;  %v1316_v29 = vadd.f32 %v1308_v62, %v1304_v24 }
 0x699   : > { %v1321_v30 = vmax.f32 %v1313_v25, 0.0  ;;  %v1314_v31 = vadd.f32 %v1308_v62, %v1302_v26 }
 0x69a   : > { %1331 = vst [vmem:[#allocation12 + $0x30] sm:$0xff] %v1323_v27  ;;  %v1324_v32 = vmax.f32 %v1316_v29, 0.0 }
 0x69b   : > { %1329 = vst [vmem:[#allocation12 + $0x20] sm:$0xff] %v1321_v30  ;;  %v1322_v33 = vmax.f32 %v1314_v31, 0.0 }
 0x69c   : > { %1332 = vst [vmem:[#allocation12 + $0x38] sm:$0xff] %v1324_v32 }
 0x69d   : > { %1330 = vst [vmem:[#allocation12 + $0x28] sm:$0xff] %v1322_v33 }
 0x69e   : > { %2111 = shalt.err (!%p2108_p4)
}
 0x69f   : > { %s2112_s11 = scalar_lea.hbm %s2603_s6, 2048 }
 0x6a0   : > { %p2113_p6 = scmp.ne.s32.totalorder %s2603_s6, %s2112_s11  ;;  %p2118_p7 = scmp.lt.u32.totalorder %s2112_s11, %s2603_s6 }
 0x6a2   : > { %p2114_p10 = pnand %p2113_p6, %p1830_p5 }
 0x6a4   : > { %p2115_p13 = pneg %p2114_p10 }
 0x6a6   : > { %p2120_p11 = pnand %p2118_p7, %p2115_p13 }
 0x6a8   : > { %2123 = shalt.err (!%p2120_p11)
}
 0x6a9   : > { %s2191_s30 = smov 128   ;;  %s2192_s20 = smov 8  }
 0x6aa   : > { %1811 = dma.vmem_to_hbm [thread:$0]  (%p1830_p5), %s1340_s14, 2048, %s2603_s6, [#allocation7], %s2191_s30, %s2191_s30, %s2192_s20  }
 0x6ab   : > { %2157 = dma.done.wait (%p1830_p5), [#allocation7], 2048  }
 0x6ac   : > { %2159 = vsyncadd (%p1830_p5), [#allocation7], 4294965248 }
 0x6ad PF: > { %p19_p12 = scmp.ge.s32.totalorder %s2250_s26, 4   ;;  %s2616_s21 = smov %s2166_s22 }
 0x6ae   : > { %s2617_s22 = smov %s2170_s23  ;;  %s2618_s23 = smov %s2260_s29 }
 0x6af   : > { %s2619_s24 = smov %s2250_s26  ;;  %21 = sbr.rel (!%p19_p12) target bundleno = 6 (0x6), region = 100 }
 0x6b6   :  { %1355 = vsyncpa [#allocation6], 1 }
 0x6b7   :  { %1357 = vsyncpa [#allocation6 + $0x1], 1 }
 0x6b8   :  { %1358 = vsyncpa [#allocation11], 1 }
 0x6b9   :  { %1360 = vsyncpa [#allocation11 + $0x1], 1 }
 0x6ba   :  { %1361 = vsyncpa [#allocation7], 1 }
 0x6bb   :  { %1363 = vsyncpa [#allocation7 + $0x1], 1 }
 0x6bc   :  { %1364 = vsyncpa [#allocation8], 1 }
 0x6bd   :  { %1366 = vsyncpa [#allocation8 + $0x1], 1 }
 0x6be   :  { %1367 = vsyncmov [#allocation4] }
 0x6c1   :  { %s1368_s25 = vpop.sfrf %1367 }
 0x6c2   :  { %p1501_p5 = scmp.ne.s32.totalorder %s1368_s25, 0 }
 0x6c4   :  { %1372 = shalt.err (%p1501_p5)  }
 0x6c5   :  { %1374 = vsyncmov [#allocation4 + $0x1] }
 0x6c8   :  { %s1375_s28 = vpop.sfrf %1374 }
 0x6c9   :  { %p1502_p9 = scmp.ne.s32.totalorder %s1375_s28, 0 }
 0x6cb   :  { %1379 = shalt.err (%p1502_p9)  }

</bundles_post_ra>
